<compile_context>
chip_gen: v7x
topology: tpu7x:2x2x1
jax: 0.10.0
libtpu: 0.0.40
codegen_flags: <defaults>
</compile_context>

<pallas_src>
import functools

import jax
import jax.numpy as jnp
from jax.experimental import pallas as pl
from jax.experimental.pallas import tpu as pltpu


def _mlp_kernel(x_ref, *refs):
    """Whole MLP evaluated on one lane-tile of the (transposed) input.

    x_ref: (d_in, TM) input tile (batch on lanes).
    refs = (w0, b0, w1, b1, ..., w_{L-1}, b_{L-1}, out_ref)
      w_i: (d_out_i, d_in_i)  — PyTorch nn.Linear layout
      b_i: (d_out_i, 1)       — broadcast along lanes
    Hidden layers use tanh; the final layer is linear (no activation).
    """
    out_ref = refs[-1]
    wb_refs = refs[:-1]
    n_layers = len(wb_refs) // 2

    x = x_ref[...].astype(jnp.float32)        # (d_in, TM)

    # ---- first layer -------------------------------------------------------
    w0 = wb_refs[0][...]                      # (d1, d_in)
    b0 = wb_refs[1][...]                      # (d1, 1)
    if x_ref.shape[0] == 1:
        # d_in == 1: outer-product broadcast on the VPU instead of a K=1 matmul.
        h = w0 * x + b0                       # (d1,1)*(1,TM) + (d1,1) -> (d1,TM)
    else:
        h = jnp.dot(w0, x, preferred_element_type=jnp.float32) + b0
    if n_layers > 1:                          # first layer is a hidden layer -> tanh (EUP)
        h = jnp.tanh(h)

    # ---- remaining layers --------------------------------------------------
    for i in range(1, n_layers):
        w = wb_refs[2 * i][...]               # (d_out, d_in)
        b = wb_refs[2 * i + 1][...]           # (d_out, 1)
        h = jnp.dot(w, h, preferred_element_type=jnp.float32) + b
        if i < n_layers - 1:                  # hidden -> tanh, output -> linear
            h = jnp.tanh(h)

    out_ref[...] = h.astype(out_ref.dtype)    # lane-dense (d_out, TM) store


def init_params(key, layers):
    """Deterministic PyTorch-default-style init: U(-1/sqrt(fan_in), +1/sqrt(fan_in)).

    Weights are (out_features, in_features) (PyTorch layout); biases are (out, 1).
    """
    params = []
    for i in range(len(layers) - 1):
        fan_in, fan_out = layers[i], layers[i + 1]
        key, kw, kb = jax.random.split(key, 3)
        bound = 1.0 / jnp.sqrt(jnp.float32(fan_in))
        w = jax.random.uniform(kw, (fan_out, fan_in), jnp.float32, -bound, bound)
        b = jax.random.uniform(kb, (fan_out, 1), jnp.float32, -bound, bound)
        params.append((w, b))
    return params


@functools.partial(jax.jit, static_argnames=("tm",))
def neural_net_forward(r, params, *, tm=2048):
    """Pallas forward pass of the PINN MLP.

    r:      (N, layers[0]) float32
    params: list of (W_(d_out, d_in), b_(d_out, 1))  — PyTorch layout
    returns (N, layers[-1]) float32
    """
    n, d_in = r.shape
    d_out = params[-1][0].shape[0]

    # Clamp the lane tile for small N (still a multiple of 128 for lane density).
    tm_eff = min(tm, max(128, ((n + 127) // 128) * 128))

    # Transposed, lane-major layout: batch on lanes, features on sublanes.
    # For the PINN d_in == 1, so this transpose is effectively a free reshape.
    x = r.T                                   # (d_in, N)

    num_tiles = pl.cdiv(n, tm_eff)            # ragged last tile handled by Pallas

    flat_params = []
    in_specs = [pl.BlockSpec((d_in, tm_eff), lambda i: (0, i))]
    for w, b in params:
        flat_params.extend([w, b])
        # Weights/biases are tiny: whole-array blocks with constant index_maps
        # stay resident in VMEM for every grid step (no re-DMA).
        in_specs.append(pl.BlockSpec(w.shape, lambda i: (0, 0)))
        in_specs.append(pl.BlockSpec(b.shape, lambda i: (0, 0)))

    out = pl.pallas_call(
        _mlp_kernel,
        out_shape=jax.ShapeDtypeStruct((d_out, n), jnp.float32),
        grid_spec=pltpu.PrefetchScalarGridSpec(
            num_scalar_prefetch=0,
            grid=(num_tiles,),
            in_specs=in_specs,
            out_specs=pl.BlockSpec((d_out, tm_eff), lambda i: (0, i)),
        ),
        compiler_params=pltpu.CompilerParams(
            dimension_semantics=("parallel",),   # lets v7x's 2 TCs split the grid
        ),
    )(x, *flat_params)

    return out.T                              # (N, d_out)


def neural_net_reference(r, params):
    """Pure-JAX reference for correctness checking (PyTorch semantics)."""
    h = r
    for i, (w, b) in enumerate(params):
        h = h @ w.T + b.T
        if i < len(params) - 1:
            h = jnp.tanh(h)
    return h


if __name__ == "__main__":
    # PINN architecture: 1-D coordinate in, scalar field out, tanh hidden layers.
    layers = [1, 32, 32, 32, 1]

    key = jax.random.PRNGKey(0)
    params = init_params(key, layers)

    # Test grid consistent with Inference.py: x = linspace(-a/2, a/2, N).reshape(N, 1)
    # N chosen so the grid has both full tiles and a ragged last tile (TM = 2048).
    N = 5000
    a = 2.0
    r = jnp.linspace(-a / 2, a / 2, N, dtype=jnp.float32).reshape((N, 1))

    y = neural_net_forward(r, params)
    y = jax.block_until_ready(y)

    y_ref = neural_net_reference(r, params)
    assert y.shape == (N, layers[-1])
    assert jnp.allclose(y, y_ref, atol=1e-5, rtol=1e-5), "Pallas output mismatch vs reference"

    print("KERNEL_OK")
</pallas_src>

<mosaic_0001>
module attributes {stable_mosaic.version = 11 : i64} {
  func.func @_mlp_kernel(%arg0: i32, %arg1: memref<1x2048xf32, #tpu.memory_space<vmem>>, %arg2: memref<32x1xf32, #tpu.memory_space<vmem>>, %arg3: memref<32x1xf32, #tpu.memory_space<vmem>>, %arg4: memref<32x32xf32, #tpu.memory_space<vmem>>, %arg5: memref<32x1xf32, #tpu.memory_space<vmem>>, %arg6: memref<32x32xf32, #tpu.memory_space<vmem>>, %arg7: memref<32x1xf32, #tpu.memory_space<vmem>>, %arg8: memref<1x32xf32, #tpu.memory_space<vmem>>, %arg9: memref<1x1xf32, #tpu.memory_space<vmem>>, %arg10: memref<1x2048xf32, #tpu.memory_space<vmem>>) attributes {dimension_semantics = [#tpu.dimension_semantics<parallel>], iteration_bounds = array<i64: 3>, scalar_prefetch = 0 : i64, scratch_operands = 0 : i64, tpu.core_type = #tpu.core_type<tc>, window_params = [{transform_indices = @transform_0, window_bounds = array<i64: 1, 2048>}, {pipeline_mode = #tpu.pipeline_mode<synchronous>, transform_indices = @transform_1, window_bounds = array<i64: 32, 1>}, {pipeline_mode = #tpu.pipeline_mode<synchronous>, transform_indices = @transform_2, window_bounds = array<i64: 32, 1>}, {pipeline_mode = #tpu.pipeline_mode<synchronous>, transform_indices = @transform_3, window_bounds = array<i64: 32, 32>}, {pipeline_mode = #tpu.pipeline_mode<synchronous>, transform_indices = @transform_4, window_bounds = array<i64: 32, 1>}, {pipeline_mode = #tpu.pipeline_mode<synchronous>, transform_indices = @transform_5, window_bounds = array<i64: 32, 32>}, {pipeline_mode = #tpu.pipeline_mode<synchronous>, transform_indices = @transform_6, window_bounds = array<i64: 32, 1>}, {pipeline_mode = #tpu.pipeline_mode<synchronous>, transform_indices = @transform_7, window_bounds = array<i64: 1, 32>}, {pipeline_mode = #tpu.pipeline_mode<synchronous>, transform_indices = @transform_8, window_bounds = array<i64: 1, 1>}, {transform_indices = @transform_9, window_bounds = array<i64: 1, 2048>}]} {
    %c0 = arith.constant 0 : index
    %c0_0 = arith.constant 0 : index
    %0 = vector.load %arg1[%c0, %c0_0] : memref<1x2048xf32, #tpu.memory_space<vmem>>, vector<1x2048xf32>
    %c0_1 = arith.constant 0 : index
    %c0_2 = arith.constant 0 : index
    %1 = vector.load %arg2[%c0_1, %c0_2] : memref<32x1xf32, #tpu.memory_space<vmem>>, vector<32x1xf32>
    %c0_3 = arith.constant 0 : index
    %c0_4 = arith.constant 0 : index
    %2 = vector.load %arg3[%c0_3, %c0_4] : memref<32x1xf32, #tpu.memory_space<vmem>>, vector<32x1xf32>
    %3 = vector.broadcast %1 : vector<32x1xf32> to vector<32x2048xf32>
    %4 = vector.broadcast %0 : vector<1x2048xf32> to vector<32x2048xf32>
    %5 = arith.mulf %3, %4 : vector<32x2048xf32>
    %6 = vector.broadcast %2 : vector<32x1xf32> to vector<32x2048xf32>
    %7 = arith.addf %5, %6 : vector<32x2048xf32>
    %8 = math.tanh %7 : vector<32x2048xf32>
    %c0_5 = arith.constant 0 : index
    %c0_6 = arith.constant 0 : index
    %9 = vector.load %arg4[%c0_5, %c0_6] : memref<32x32xf32, #tpu.memory_space<vmem>>, vector<32x32xf32>
    %c0_7 = arith.constant 0 : index
    %c0_8 = arith.constant 0 : index
    %10 = vector.load %arg5[%c0_7, %c0_8] : memref<32x1xf32, #tpu.memory_space<vmem>>, vector<32x1xf32>
    %cst = arith.constant dense<0.000000e+00> : vector<32x2048xf32>
    %11 = tpu.matmul %9, %8, %cst {dimension_numbers = #tpu.dot_dimension_numbers<[1], [0], [0], [1], [0, 0, 1, 1], [], []>} : vector<32x32xf32>, vector<32x2048xf32>, vector<32x2048xf32> -> vector<32x2048xf32>
    %12 = vector.broadcast %10 : vector<32x1xf32> to vector<32x2048xf32>
    %13 = arith.addf %11, %12 : vector<32x2048xf32>
    %14 = math.tanh %13 : vector<32x2048xf32>
    %c0_9 = arith.constant 0 : index
    %c0_10 = arith.constant 0 : index
    %15 = vector.load %arg6[%c0_9, %c0_10] : memref<32x32xf32, #tpu.memory_space<vmem>>, vector<32x32xf32>
    %c0_11 = arith.constant 0 : index
    %c0_12 = arith.constant 0 : index
    %16 = vector.load %arg7[%c0_11, %c0_12] : memref<32x1xf32, #tpu.memory_space<vmem>>, vector<32x1xf32>
    %cst_13 = arith.constant dense<0.000000e+00> : vector<32x2048xf32>
    %17 = tpu.matmul %15, %14, %cst_13 {dimension_numbers = #tpu.dot_dimension_numbers<[1], [0], [0], [1], [0, 0, 1, 1], [], []>} : vector<32x32xf32>, vector<32x2048xf32>, vector<32x2048xf32> -> vector<32x2048xf32>
    %18 = vector.broadcast %16 : vector<32x1xf32> to vector<32x2048xf32>
    %19 = arith.addf %17, %18 : vector<32x2048xf32>
    %20 = math.tanh %19 : vector<32x2048xf32>
    %c0_14 = arith.constant 0 : index
    %c0_15 = arith.constant 0 : index
    %21 = vector.load %arg8[%c0_14, %c0_15] : memref<1x32xf32, #tpu.memory_space<vmem>>, vector<1x32xf32>
    %c0_16 = arith.constant 0 : index
    %c0_17 = arith.constant 0 : index
    %22 = vector.load %arg9[%c0_16, %c0_17] : memref<1x1xf32, #tpu.memory_space<vmem>>, vector<1x1xf32>
    %cst_18 = arith.constant dense<0.000000e+00> : vector<1x2048xf32>
    %23 = tpu.matmul %21, %20, %cst_18 {dimension_numbers = #tpu.dot_dimension_numbers<[1], [0], [0], [1], [0, 0, 1, 1], [], []>} : vector<1x32xf32>, vector<32x2048xf32>, vector<1x2048xf32> -> vector<1x2048xf32>
    %24 = vector.broadcast %22 : vector<1x1xf32> to vector<1x2048xf32>
    %25 = arith.addf %23, %24 : vector<1x2048xf32>
    %c0_19 = arith.constant 0 : index
    %c0_20 = arith.constant 0 : index
    %26 = vector.load %arg10[%c0_19, %c0_20] : memref<1x2048xf32, #tpu.memory_space<vmem>>, vector<1x2048xf32>
    tpu.vector_store %arg10[%c0_19, %c0_20], %25 {strides = array<i32>} : memref<1x2048xf32, #tpu.memory_space<vmem>>, vector<1x2048xf32>,
    return
  }
  func.func @transform_0(%arg0: i32) -> (i32, i32) {
    %c0_i32 = arith.constant 0 : i32
    %c0_i32_0 = arith.constant 0 : i32
    return %c0_i32, %arg0 : i32, i32
  }
  func.func @transform_1(%arg0: i32) -> (i32, i32) {
    %c0_i32 = arith.constant 0 : i32
    %c0_i32_0 = arith.constant 0 : i32
    %c0_i32_1 = arith.constant 0 : i32
    return %c0_i32, %c0_i32_0 : i32, i32
  }
  func.func @transform_2(%arg0: i32) -> (i32, i32) {
    %c0_i32 = arith.constant 0 : i32
    %c0_i32_0 = arith.constant 0 : i32
    %c0_i32_1 = arith.constant 0 : i32
    return %c0_i32, %c0_i32_0 : i32, i32
  }
  func.func @transform_3(%arg0: i32) -> (i32, i32) {
    %c0_i32 = arith.constant 0 : i32
    %c0_i32_0 = arith.constant 0 : i32
    %c0_i32_1 = arith.constant 0 : i32
    return %c0_i32, %c0_i32_0 : i32, i32
  }
  func.func @transform_4(%arg0: i32) -> (i32, i32) {
    %c0_i32 = arith.constant 0 : i32
    %c0_i32_0 = arith.constant 0 : i32
    %c0_i32_1 = arith.constant 0 : i32
    return %c0_i32, %c0_i32_0 : i32, i32
  }
  func.func @transform_5(%arg0: i32) -> (i32, i32) {
    %c0_i32 = arith.constant 0 : i32
    %c0_i32_0 = arith.constant 0 : i32
    %c0_i32_1 = arith.constant 0 : i32
    return %c0_i32, %c0_i32_0 : i32, i32
  }
  func.func @transform_6(%arg0: i32) -> (i32, i32) {
    %c0_i32 = arith.constant 0 : i32
    %c0_i32_0 = arith.constant 0 : i32
    %c0_i32_1 = arith.constant 0 : i32
    return %c0_i32, %c0_i32_0 : i32, i32
  }
  func.func @transform_7(%arg0: i32) -> (i32, i32) {
    %c0_i32 = arith.constant 0 : i32
    %c0_i32_0 = arith.constant 0 : i32
    %c0_i32_1 = arith.constant 0 : i32
    return %c0_i32, %c0_i32_0 : i32, i32
  }
  func.func @transform_8(%arg0: i32) -> (i32, i32) {
    %c0_i32 = arith.constant 0 : i32
    %c0_i32_0 = arith.constant 0 : i32
    %c0_i32_1 = arith.constant 0 : i32
    return %c0_i32, %c0_i32_0 : i32, i32
  }
  func.func @transform_9(%arg0: i32) -> (i32, i32) {
    %c0_i32 = arith.constant 0 : i32
    %c0_i32_0 = arith.constant 0 : i32
    return %c0_i32, %arg0 : i32, i32
  }
}

</mosaic_0001>

<bundles_post_ra>
// kernel: neural_net_forward.1
= control target key start
LH: loop header
LB: loop body
LE: loop exit
PB: predicated region body
PF: predicated region fallthrough
CT: control target
= control target key end

     0   :  { %s4773_s0 = inlined_call_operand.vmem [shape: f32[1,5000], index: 0, kind: input, shape index: {}]   ;;  %s4774_s1 = inlined_call_operand.vmem [shape: f32[32,1], index: 1, kind: input, shape index: {}]   ;;  %s4775_s2 = inlined_call_operand.vmem [shape: f32[32,1], index: 2, kind: input, shape index: {}]   ;;  %s4776_s3 = inlined_call_operand.vmem [shape: f32[32,32], index: 3, kind: input, shape index: {}]   ;;  %s4777_s4 = inlined_call_operand.vmem [shape: f32[32,1], index: 4, kind: input, shape index: {}]   ;;  %s4778_s5 = inlined_call_operand.vmem [shape: f32[32,32], index: 5, kind: input, shape index: {}]   ;;  %s4779_s6 = inlined_call_operand.vmem [shape: f32[32,1], index: 6, kind: input, shape index: {}]   ;;  %s4780_s7 = inlined_call_operand.vmem [shape: f32[1,32], index: 7, kind: input, shape index: {}]   ;;  %s4781_s8 = inlined_call_operand.<no memory space> [shape: f32[1,1], index: 8, kind: input, shape index: {}]   ;;  %s4782_s9 = inlined_call_operand.hbm [shape: f32[1,5000], index: 9, kind: output, shape index: {}]  }
   0x1   :  { %v14_v0 = vstv %s4781_s8 }
   0x2   :  { %15 = vst [vmem:[#allocation2] sm:$0x1] %v14_v0 }
   0x3   :  { %16 = vsyncpa [#allocation4], 0 }
   0x4   :  { %18 = vsyncpa [#allocation4 + $0x1], 0  ;;  %s3916_s11 = smov 0   ;;  %s3918_s12 = smov 0  }
   0x5   :  { %s3920_s13 = smov 0   ;;  %s3922_s14 = smov 0  }
   0x6 LB: > { %s3937_s8 = sadd.s32 4294967295, %s3857_s14   ;;  %s3090_s15 = sadd.s32 4294967294, %s3857_s14   ;;  %s3857_s14 = sphi %s3922_s14, %s4788_s14   ;;  %s3853_s13 = sphi %s3920_s13, %s4787_s13   ;;  %s3849_s12 = sphi %s3918_s12, %s4786_s12   ;;  %s3845_s11 = sphi %s3916_s11, %s4785_s11  }
   0x7   : > { %s3941_s16 = sadd.s32 1, %s3857_s14   ;;  %s225_s17 = sadd.s32 1, %s3853_s13 }
   0x8   : > { %s222_s18 = ssub.s32 %s3857_s14, %s3941_s16  ;;  %p235_p0 = scmp.ne.s32.totalorder %s3853_s13, %s3849_s12 }
   0x9   : > { %p223_p1 = scmp.eq.s32.totalorder %s222_s18, 0  ;;  %p236_p2 = scmp.eq.s32.totalorder %s3937_s8, 2 }
   0xa   : > { %p241_p3 = scmp.ne.s32.totalorder %s3849_s12, %s3845_s11  ;;  %p242_p4 = scmp.eq.s32.totalorder %s3090_s15, 2 }
   0xb   : > { %s3952_s19 = scalar_select %p223_p1, %s3853_s13, %s225_s17  }
   0xc   : > { %p3954_p5 = por %p236_p2, %p235_p0  ;;  %p3958_p6 = por %p242_p4, %p241_p3 }
   0xd   : > { %p3093_p7 = scmp.ge.s32.totalorder %s3857_s14, 1  ;;  %p300_p8 = scmp.lt.s32.totalorder %s3857_s14, 4 }
   0xf   : > { %p301_p9 = pnand %p3093_p7, %p300_p8 }
  0x10   : > { %v363_v1 = vld [vmem:[%s4775_s2] sm:$0xff] (!%p301_p9)  ;;  %v3859_v3 = vmov (!%p301_p9), 0   ;;  %v364_v4 = vld [vmem:[%s4775_s2 + $0x8] sm:$0xff] (!%p301_p9)  ;;  %v362_v6 = vld [vmem:[%s4774_s1 + $0x18] sm:$0xff] (!%p301_p9)  ;;  %v3860_v19 = vmov (!%p301_p9), 0.0   ;;  %s4015_s28 = sshll.u32 (!%p301_p9), %s3937_s8, 4  ;;  %v389_v20 = vlaneseq (!%p301_p9) }
  0x11   : > { %304 = sbr.rel (%p301_p9) target bundleno = 972 (0x3cc), region = 56  ;;  %v359_v2 = vld [vmem:[%s4774_s1] sm:$0xff] (!%p301_p9)  ;;  %3410 = vset.pattern.permute.xlu1 (!%p301_p9), %v3859_v3  ;;  %3409 = vset.pattern.permute.xlu0 (!%p301_p9), %v3859_v3  ;;  %v360_v5 = vld [vmem:[%s4774_s1 + $0x8] sm:$0xff] (!%p301_p9)  ;;  %v361_v7 = vld [vmem:[%s4774_s1 + $0x10] sm:$0xff] (!%p301_p9)  ;;  %p344_p10 = scmp.lt.s32.totalorder (!%p301_p9), %s4015_s28, 39  ;;  %vm709_vm0 = vcmask (!%p301_p9), 261120  }
  0x12   : > { %535 = vperm.xlu1 (!%p301_p9), %3410, %v363_v1   ;;  %369 = vperm.xlu0 (!%p301_p9), %3409, %v359_v2   ;;  %v366_v8 = vld [vmem:[%s4775_s2 + $0x18] sm:$0xff] (!%p301_p9)  ;;  %v365_v9 = vld [vmem:[%s4775_s2 + $0x10] sm:$0xff] (!%p301_p9)  ;;  %v686_v10 = vld [vmem:[%s4777_s4 + $0x8] sm:$0xff] (!%p301_p9)  ;;  %v4019_v21 = vshrl.u32 (!%p301_p9), %v389_v20, 7  ;;  %s336_s26 = sand.u32 (!%p301_p9), 1, %s3849_s12  }
  0x13   : > { %v685_v11 = vld [vmem:[%s4777_s4] sm:$0xff] (!%p301_p9)  ;;  %v688_v12 = vld [vmem:[%s4777_s4 + $0x18] sm:$0xff] (!%p301_p9)  ;;  %v687_v13 = vld [vmem:[%s4777_s4 + $0x10] sm:$0xff] (!%p301_p9)  ;;  %786 = vmatprep.mubr.f32.mxu0 (!%p301_p9), %v3860_v19  ;;  %875 = vmatprep.mubr.f32.mxu1 (!%p301_p9), %v3860_v19  ;;  %s3094_s27 = sshll.u32 (!%p301_p9), %s336_s26, 4  ;;  %s4718_s30 = scalar_lea.sflag (!%p301_p9), [#allocation4], %s336_s26 }
  0x14   : > { %v1503_v14 = vld [vmem:[%s4779_s6 + $0x8] sm:$0xff] (!%p301_p9)  ;;  %v1502_v15 = vld [vmem:[%s4779_s6] sm:$0xff] (!%p301_p9)  ;;  %v1505_v16 = vld [vmem:[%s4779_s6 + $0x18] sm:$0xff] (!%p301_p9)  ;;  %v395_v22 = vsub.s32 (!%p301_p9), 1, %v4019_v21  ;;  %v403_v23 = vsub.s32 (!%p301_p9), 3, %v4019_v21  ;;  %v4029_v24 = vsub.s32 (!%p301_p9), 0, %v4019_v21 }
  0x15   : > { %v1504_v17 = vld [vmem:[%s4779_s6 + $0x10] sm:$0xff] (!%p301_p9)  ;;  %v2315_v18 = vld [vmem:[#allocation2] sm:$0x1] (!%p301_p9)  ;;  %v399_v25 = vsub.s32 (!%p301_p9), 2, %v4019_v21  ;;  %v411_v47 = vsub.s32 (!%p301_p9), 5, %v4019_v21  ;;  %v419_v54 = vsub.s32 (!%p301_p9), 7, %v4019_v21 }
  0x16   : > { %540 = vperm.xlu1 (!%p301_p9), %3410, %v364_v4   ;;  %374 = vperm.xlu0 (!%p301_p9), %3409, %v360_v5   ;;  %v407_v56 = vsub.s32 (!%p301_p9), 4, %v4019_v21  ;;  %v415_v0 = vsub.s32 (!%p301_p9), 6, %v4019_v21 }
  0x18   : > { %s345_s29 = scalar_select %p344_p10, %s4015_s28, 39 }
  0x19   : > { %s3023_s10 = ssub.s32 (%p3954_p5), 40, %s4015_s28 }
  0x1a   : > { %384 = vperm.xlu1 %3410, %v362_v6   ;;  %379 = vperm.xlu0 %3409, %v361_v7   ;;  %s4024_s15 = scalar_lea.vmem %s4773_s0, %s345_s29  ;;  %s4712_s29 = scalar_lea.vmem [#allocation3], %s3094_s27 }
  0x1b   : > { %v4033_v26 = vld [vmem:[%s4024_s15] sm:$0xff]  ;;  %p3024_p11 = scmp.lt.s32.totalorder (%p3954_p5), %s3023_s10, 16 }
  0x1c   : > { %v396_v27 = vrot.slane %v4033_v26, %v395_v22  ;;  %v404_v28 = vrot.slane %v4033_v26, %v403_v23  ;;  %v392_v29 = vrot.slane %v4033_v26, %v4029_v24  ;;  %v400_v30 = vrot.slane %v4033_v26, %v399_v25 }
  0x1d   : > { %v4079_v55 = vrot.slane %v4033_v26, %v411_v47  ;;  %v4093_v63 = vrot.slane %v4033_v26, %v419_v54  ;;  %v4105_v7 = vrot.slane %v4033_v26, %v407_v56  ;;  %v4121_v20 = vrot.slane %v4033_v26, %v415_v0 }
  0x1e   : > { %550 = vperm.xlu1 %3410, %v366_v8   ;;  %545 = vperm.xlu0 %3409, %v365_v9  }
  0x22   : > { %696 = vperm.xlu1 %3410, %v686_v10   ;;  %691 = vperm.xlu0 %3409, %v685_v11  }
  0x26   : > { %706 = vperm.xlu1 %3410, %v688_v12   ;;  %701 = vperm.xlu0 %3409, %v687_v13  }
  0x2a   : > { %1513 = vperm.xlu1 %3410, %v1503_v14   ;;  %1508 = vperm.xlu0 %3409, %v1502_v15  }
  0x2e   : > { %1523 = vperm.xlu1 %3410, %v1505_v16   ;;  %1518 = vperm.xlu0 %3409, %v1504_v17  }
  0x32   : > { %2318 = vperm.xlu0 %3409, %v2315_v18  }
  0x91   : > { %v4046_v31 = vpop.permute.xlu1 %535  ;;  %v4048_v32 = vpop.permute.xlu0 %369 }
  0x92   : > { %v470_v33 = vmul.f32 %v396_v27, %v4048_v32  ;;  %v472_v34 = vmul.f32 %v404_v28, %v4048_v32  ;;  %v469_v35 = vmul.f32 %v392_v29, %v4048_v32  ;;  %v471_v36 = vmul.f32 %v400_v30, %v4048_v32 }
  0x93   : > { %v474_v11 = vmul.f32 %v4079_v55, %v4048_v32  ;;  %v476_v18 = vmul.f32 %v4093_v63, %v4048_v32 }
  0x94   : > { %v554_v37 = vadd.f32 %v4046_v31, %v470_v33  ;;  %v556_v38 = vadd.f32 %v4046_v31, %v472_v34  ;;  %v553_v39 = vadd.f32 %v4046_v31, %v469_v35  ;;  %v555_v42 = vadd.f32 %v4046_v31, %v471_v36 }
  0x95   : > { %v4057_v40 = vpop.permute.xlu1 %540  ;;  %v4059_v41 = vpop.permute.xlu0 %374  ;;  %v558_v33 = vadd.f32 %v4046_v31, %v474_v11  ;;  %v473_v34 = vmul.f32 %v4105_v7, %v4048_v32 }
  0x96   : > { %v486_v43 = vmul.f32 %v396_v27, %v4059_v41  ;;  %3411 = vtanh.f32 %v554_v37  ;;  %v488_v44 = vmul.f32 %v404_v28, %v4059_v41  ;;  %v485_v45 = vmul.f32 %v392_v29, %v4059_v41 }
  0x97   : > { %3413 = vtanh.f32 %v556_v38  ;;  %v487_v46 = vmul.f32 %v400_v30, %v4059_v41  ;;  %v490_v15 = vmul.f32 %v4079_v55, %v4059_v41  ;;  %v489_v37 = vmul.f32 %v4105_v7, %v4059_v41 }
  0x98   : > { %v570_v48 = vadd.f32 %v4057_v40, %v486_v43  ;;  %v572_v49 = vadd.f32 %v4057_v40, %v488_v44  ;;  %v569_v50 = vadd.f32 %v4057_v40, %v485_v45  ;;  %3415 = vtanh.f32 %v553_v39  ;;  %v4133_v39 = vld [vmem:[%s4024_s15 + $0x8] sm:$0xff] }
  0x99   : > { %v4070_v51 = vpop.permute.xlu1 %384  ;;  %v4072_v52 = vpop.permute.xlu0 %379  ;;  %v571_v53 = vadd.f32 %v4057_v40, %v487_v46  ;;  %3417 = vtanh.f32 %v555_v42  ;;  %v574_v26 = vadd.f32 %v4057_v40, %v490_v15  ;;  %v560_v43 = vadd.f32 %v4046_v31, %v476_v18 }
  0x9a   : > { %3419 = vtanh.f32 %v570_v48  ;;  %v502_v57 = vmul.f32 %v396_v27, %v4072_v52  ;;  %v518_v58 = vmul.f32 %v396_v27, %v4070_v51  ;;  %v504_v59 = vmul.f32 %v404_v28, %v4072_v52 }
  0x9b   : > { %3421 = vtanh.f32 %v572_v49  ;;  %v520_v62 = vmul.f32 %v404_v28, %v4070_v51  ;;  %v501_v4 = vmul.f32 %v392_v29, %v4072_v52  ;;  %v517_v6 = vmul.f32 %v392_v29, %v4070_v51 }
  0x9c   : > { %3423 = vtanh.f32 %v569_v50  ;;  %v503_v10 = vmul.f32 %v400_v30, %v4072_v52  ;;  %v519_v14 = vmul.f32 %v400_v30, %v4070_v51  ;;  %v492_v29 = vmul.f32 %v4093_v63, %v4059_v41 }
  0x9d   : > { %v4085_v60 = vpop.permute.xlu1 %550  ;;  %v4087_v61 = vpop.permute.xlu0 %545  ;;  %3425 = vtanh.f32 %v571_v53  ;;  %v475_v44 = vmul.f32 %v4121_v20, %v4048_v32  ;;  %v491_v49 = vmul.f32 %v4121_v20, %v4059_v41  ;;  %v557_v53 = vadd.f32 %v4046_v31, %v473_v34 }
  0x9e   : > { %v586_v1 = vadd.f32 %v4087_v61, %v502_v57  ;;  %v602_v2 = vadd.f32 %v4085_v60, %v518_v58  ;;  %v588_v3 = vadd.f32 %v4087_v61, %v504_v59  ;;  %v604_v5 = vadd.f32 %v4085_v60, %v520_v62 }
  0x9f   : > { %v585_v9 = vadd.f32 %v4087_v61, %v501_v4  ;;  %v601_v13 = vadd.f32 %v4085_v60, %v517_v6  ;;  %v587_v17 = vadd.f32 %v4087_v61, %v503_v10  ;;  %v603_v28 = vadd.f32 %v4085_v60, %v519_v14 }
  0xa0   : > { %v3412_v8 = vpop.eup %3411  ;;  %3427 = vtanh.f32 %v586_v1  ;;  %v576_v48 = vadd.f32 %v4057_v40, %v492_v29  ;;  %v4145_v57 = vrot.slane %v4133_v39, %v399_v25  ;;  %v573_v58 = vadd.f32 %v4057_v40, %v489_v37  ;;  %v4193_v37 = vld [vmem:[%s4776_s3] sm:$0xff] }
  0xa1   : > { %v3414_v12 = vpop.eup %3413  ;;  %3429 = vtanh.f32 %v602_v2  ;;  %v4151_v59 = vrot.slane %v4133_v39, %v395_v22  ;;  %v559_v1 = vadd.f32 %v4046_v31, %v475_v44  ;;  %v506_v2 = vmul.f32 %v4079_v55, %v4072_v52 }
  0xa2   : > { %v3416_v16 = vpop.eup %3415  ;;  %3431 = vtanh.f32 %v588_v3  ;;  %v4159_v25 = vrot.slane %v4133_v39, %v403_v23  ;;  %v575_v4 = vadd.f32 %v4057_v40, %v491_v49  ;;  %v522_v22 = vmul.f32 %v4079_v55, %v4070_v51 }
  0xa3   : > { %v3418_v27 = vpop.eup %3417  ;;  %3433 = vtanh.f32 %v604_v5  ;;  %v4166_v5 = vrot.slane %v4133_v39, %v4029_v24  ;;  %v508_v23 = vmul.f32 %v4093_v63, %v4072_v52  ;;  %v524_v55 = vmul.f32 %v4093_v63, %v4070_v51 }
  0xa4   : > { %v3420_v30 = vpop.eup %3419  ;;  %3435 = vtanh.f32 %v585_v9  ;;  %v590_v9 = vadd.f32 %v4087_v61, %v506_v2  ;;  %v606_v11 = vadd.f32 %v4085_v60, %v522_v22  ;;  %v505_v15 = vmul.f32 %v4105_v7, %v4072_v52  ;;  %v4213_v2 = vld [vmem:[%s4776_s3 + $0x8] sm:$0xff] }
  0xa5   : > { %v3422_v35 = vpop.eup %3421  ;;  %v3176_v36 = vpack.c.bf16 %v3420_v30, %v3412_v8  ;;  %3437 = vtanh.f32 %v601_v13  ;;  %v592_v14 = vadd.f32 %v4087_v61, %v508_v23  ;;  %v521_v18 = vmul.f32 %v4105_v7, %v4070_v51 }
  0xa6   : > { %v3424_v38 = vpop.eup %3423  ;;  %v3184_v42 = vpack.c.bf16 %v3422_v35, %v3414_v12  ;;  %3439 = vtanh.f32 %v587_v17  ;;  %v608_v17 = vadd.f32 %v4085_v60, %v524_v55  ;;  %v589_v29 = vadd.f32 %v4087_v61, %v505_v15 }
  0xa7   : > { %v3426_v45 = vpop.eup %3425  ;;  %3177 = vmatprep.subr.bf16.mxu0 %v3176_v36  ;;  %v3178_v46 = vpack.c.bf16 %v3424_v38, %v3416_v16  ;;  %3441 = vtanh.f32 %v603_v28  ;;  %v478_v30 = vmul.f32 %v4151_v59, %v4048_v32  ;;  %v605_v34 = vadd.f32 %v4085_v60, %v521_v18 }
  0xa8   : > { %3185 = vmatprep.subr.bf16.mxu1 %v3184_v42  ;;  %v3186_v50 = vpack.c.bf16 %v3426_v45, %v3418_v27  ;;  %3443 = vtanh.f32 %v558_v33  ;;  %v507_v27 = vmul.f32 %v4121_v20, %v4072_v52  ;;  %v523_v35 = vmul.f32 %v4121_v20, %v4070_v51 }
  0xa9   : > { %3179 = vmatpush1.bf16.msra.mxu0 %v3178_v46  ;;  %3445 = vtanh.f32 %v574_v26  ;;  %v494_v7 = vmul.f32 %v4151_v59, %v4059_v41  ;;  %v480_v42 = vmul.f32 %v4159_v25, %v4048_v32  ;;  %v496_v44 = vmul.f32 %v4159_v25, %v4059_v41 }
  0xaa   : > { %v3428_v62 = vpop.eup %3427  ;;  %3187 = vmatpush1.bf16.msra.mxu1 %v3186_v50  ;;  %3447 = vtanh.f32 %v560_v43  ;;  %v591_v38 = vadd.f32 %v4087_v61, %v507_v27  ;;  %v607_v20 = vadd.f32 %v4085_v60, %v523_v35  ;;  %v477_v49 = vmul.f32 %v4166_v5, %v4048_v32 }
  0xab   : > { %v3430_v3 = vpop.eup %3429  ;;  %3449 = vtanh.f32 %v576_v48  ;;  %v562_v48 = vadd.f32 %v4046_v31, %v478_v30  ;;  %v526_v27 = vmul.f32 %v4151_v59, %v4070_v51  ;;  %v4269_v35 = vrot.slane %v4133_v39, %v415_v0 }
  0xac   : > { %v3432_v6 = vpop.eup %3431  ;;  %v3180_v8 = vpack.c.bf16 %v3430_v3, %v3428_v62  ;;  %3451 = vtanh.f32 %v557_v53  ;;  %v578_v53 = vadd.f32 %v4057_v40, %v494_v7  ;;  %v564_v3 = vadd.f32 %v4046_v31, %v480_v42 }
  0xad   : > { %v3434_v10 = vpop.eup %3433  ;;  %3453 = vtanh.f32 %v573_v58  ;;  %v493_v58 = vmul.f32 %v4166_v5, %v4059_v41 }
  0xae   : > { %v3436_v12 = vpop.eup %3435  ;;  %3181 = vmatprep.subr.bf16.mxu0 %v3180_v8  ;;  %v3188_v13 = vpack.c.bf16 %v3434_v10, %v3432_v6  ;;  %3455 = vtanh.f32 %v559_v1  ;;  %v580_v6 = vadd.f32 %v4057_v40, %v496_v44  ;;  %v495_v8 = vmul.f32 %v4145_v57, %v4059_v41 }
  0xaf   : > { %v3438_v16 = vpop.eup %3437  ;;  %3457 = vtanh.f32 %v575_v4  ;;  %v479_v4 = vmul.f32 %v4145_v57, %v4048_v32  ;;  %v561_v10 = vadd.f32 %v4046_v31, %v477_v49  ;;  %v577_v55 = vadd.f32 %v4057_v40, %v493_v58 }
  0xb0   : > { %v3440_v63 = vpop.eup %3439  ;;  %3189 = vmatprep.subr.bf16.mxu1 %v3188_v13  ;;  %v3182_v28 = vpack.c.bf16 %v3438_v16, %v3436_v12  ;;  %3459 = vtanh.f32 %v590_v9  ;;  %v4231_v12 = vrot.slane %v4133_v39, %v411_v47  ;;  %v4236_v13 = vrot.slane %v4133_v39, %v419_v54  ;;  %v4242_v16 = vld [vmem:[%s4776_s3 + $0x10] sm:$0xff] }
  0xb1   : > { %v3442_v33 = vpop.eup %3441  ;;  %3461 = vtanh.f32 %v606_v11  ;;  %v510_v47 = vmul.f32 %v4151_v59, %v4072_v52  ;;  %v579_v54 = vadd.f32 %v4057_v40, %v495_v8  ;;  %v610_v59 = vadd.f32 %v4085_v60, %v526_v27 }
  0xb2   : > { %v3444_v36 = vpop.eup %3443  ;;  %3183 = vmatpush1.bf16.msra.mxu0 %v3182_v28  ;;  %v3190_v26 = vpack.c.bf16 %v3442_v33, %v3440_v63  ;;  %3463 = vtanh.f32 %v592_v14  ;;  %v4255_v63 = vrot.slane %v4133_v39, %v407_v56  ;;  %v512_v33 = vmul.f32 %v4159_v25, %v4072_v52 }
  0xb3   : > { %v3446_v43 = vpop.eup %3445  ;;  %3465 = vtanh.f32 %v608_v17  ;;  %v563_v17 = vadd.f32 %v4046_v31, %v479_v4  ;;  %v594_v30 = vadd.f32 %v4087_v61, %v510_v47  ;;  %v528_v56 = vmul.f32 %v4159_v25, %v4070_v51 }
  0xb4   : > { %v3448_v45 = vpop.eup %3447  ;;  %3191 = vmatpush1.bf16.msra.mxu1 %v3190_v26  ;;  %v3192_v46 = vpack.c.bf16 %v3446_v43, %v3444_v36  ;;  %3467 = vtanh.f32 %v589_v29  ;;  %v4275_v26 = vld [vmem:[%s4776_s3 + $0x18] sm:$0xff]  ;;  %v509_v25 = vmul.f32 %v4166_v5, %v4072_v52  ;;  %v525_v39 = vmul.f32 %v4166_v5, %v4070_v51 }
  0xb5   : > { %v3450_v50 = vpop.eup %3449  ;;  %3096 = vmatmul.mubr.msk.f32.vlgmr.msra.gmra.mrb[0].mxu0 %vm709_vm0, %v4193_v37  ;;  %3469 = vtanh.f32 %v605_v34  ;;  %v612_v0 = vadd.f32 %v4085_v60, %v528_v56  ;;  %v511_v43 = vmul.f32 %v4145_v57, %v4072_v52  ;;  %v527_v49 = vmul.f32 %v4145_v57, %v4070_v51 }
  0xb6   : > { %v3452_v62 = vpop.eup %3451  ;;  %3193 = vmatprep.subr.bf16.mxu0 %v3192_v46  ;;  %v3200_v1 = vpack.c.bf16 %v3450_v50, %v3448_v45  ;;  %792 = vmatprep.mubr.f32.mxu0 %v3860_v19  ;;  %3471 = vtanh.f32 %v591_v38  ;;  %v596_v38 = vadd.f32 %v4087_v61, %v512_v33  ;;  %v593_v45 = vadd.f32 %v4087_v61, %v509_v25 }
  0xb7   : > { %v3454_v22 = vpop.eup %3453  ;;  %3100 = vmatmul.mubr.msk.f32.vlgmr.msra.gmra.mrb[0].mxu1 %vm709_vm0, %v4193_v37  ;;  %3473 = vtanh.f32 %v607_v20  ;;  %v482_v46 = vmul.f32 %v4231_v12, %v4048_v32  ;;  %v609_v5 = vadd.f32 %v4085_v60, %v525_v39  ;;  %v498_v50 = vmul.f32 %v4231_v12, %v4059_v41 }
  0xb8   : > { %v3456_v9 = vpop.eup %3455  ;;  %3201 = vmatprep.subr.bf16.mxu1 %v3200_v1  ;;  %v3194_v23 = vpack.c.bf16 %v3454_v22, %v3452_v62  ;;  %881 = vmatprep.mubr.f32.mxu1 %v3860_v19  ;;  %3475 = vtanh.f32 %v562_v48  ;;  %v595_v62 = vadd.f32 %v4087_v61, %v511_v43  ;;  %v484_v1 = vmul.f32 %v4236_v13, %v4048_v32 }
  0xb9   : > { %v3458_v11 = vpop.eup %3457  ;;  %3097 = vmatmul.mubr.msk.f32.gmra.mrb[2].mxu0 %vm709_vm0, %v4213_v2  ;;  %3477 = vtanh.f32 %v578_v53  ;;  %v611_v57 = vadd.f32 %v4085_v60, %v527_v49  ;;  %v500_v4 = vmul.f32 %v4236_v13, %v4059_v41  ;;  %v566_v8 = vadd.f32 %v4046_v31, %v482_v46 }
  0xba   : > { %v3460_v14 = vpop.eup %3459  ;;  %3195 = vmatpush1.bf16.msra.mxu0 %v3194_v23  ;;  %v3202_v15 = vpack.c.bf16 %v3458_v11, %v3456_v9  ;;  %3479 = vtanh.f32 %v564_v3  ;;  %798 = vmatprep.mubr.f32.mxu0 %v3860_v19  ;;  %v481_v9 = vmul.f32 %v4255_v63, %v4048_v32  ;;  %v497_v11 = vmul.f32 %v4255_v63, %v4059_v41 }
  0xbb   : > { %v3462_v18 = vpop.eup %3461  ;;  %3101 = vmatmul.mubr.msk.f32.gmra.mrb[2].mxu1 %vm709_vm0, %v4213_v2  ;;  %3481 = vtanh.f32 %v580_v6 }
  0xbc   : > { %v3464_v28 = vpop.eup %3463  ;;  %3203 = vmatpush1.bf16.msra.mxu1 %v3202_v15  ;;  %v3196_v29 = vpack.c.bf16 %v3462_v18, %v3460_v14  ;;  %887 = vmatprep.mubr.f32.mxu1 %v3860_v19  ;;  %3483 = vtanh.f32 %v561_v10  ;;  %v582_v10 = vadd.f32 %v4057_v40, %v498_v50  ;;  %v568_v15 = vadd.f32 %v4046_v31, %v484_v1 }
  0xbd   : > { %v3466_v34 = vpop.eup %3465  ;;  %3098 = vmatmul.mubr.msk.f32.gmra.mrb[4].mxu0 %vm709_vm0, %v4242_v16  ;;  %3485 = vtanh.f32 %v577_v55  ;;  %v584_v18 = vadd.f32 %v4057_v40, %v500_v4  ;;  %v515_v50 = vmul.f32 %v4269_v35, %v4072_v52 }
  0xbe   : > { %v3468_v7 = vpop.eup %3467  ;;  %3197 = vmatprep.subr.bf16.mxu0 %v3196_v29  ;;  %v3204_v36 = vpack.c.bf16 %v3466_v34, %v3464_v28  ;;  %804 = vmatprep.mubr.f32.mxu0 %v3860_v19  ;;  %3487 = vtanh.f32 %v563_v17  ;;  %v483_v17 = vmul.f32 %v4269_v35, %v4048_v32  ;;  %v565_v29 = vadd.f32 %v4046_v31, %v481_v9 }
  0xbf   : > { %v3470_v42 = vpop.eup %3469  ;;  %3102 = vmatmul.mubr.msk.f32.gmra.mrb[4].mxu1 %vm709_vm0, %v4242_v16  ;;  %3489 = vtanh.f32 %v579_v54  ;;  %v499_v54 = vmul.f32 %v4269_v35, %v4059_v41  ;;  %v581_v32 = vadd.f32 %v4057_v40, %v497_v11 }
  0xc0   : > { %v3472_v20 = vpop.eup %3471  ;;  %3205 = vmatprep.subr.bf16.mxu1 %v3204_v36  ;;  %v3198_v44 = vpack.c.bf16 %v3470_v42, %v3468_v7  ;;  %893 = vmatprep.mubr.f32.mxu1 %v3860_v19  ;;  %3491 = vtanh.f32 %v594_v30  ;;  %v567_v41 = vadd.f32 %v4046_v31, %v483_v17  ;;  %v530_v36 = vmul.f32 %v4231_v12, %v4070_v51 }
  0xc1   : > { %v3474_v48 = vpop.eup %3473  ;;  %3099 = vmatmul.mubr.msk.f32.gmra.mrb[6].mxu0 %vm709_vm0, %v4275_v26  ;;  %3493 = vtanh.f32 %v610_v59  ;;  %v514_v59 = vmul.f32 %v4231_v12, %v4072_v52  ;;  %v583_v7 = vadd.f32 %v4057_v40, %v499_v54  ;;  %v516_v42 = vmul.f32 %v4236_v13, %v4072_v52 }
  0xc2   : > { %v3476_v53 = vpop.eup %3475  ;;  %3199 = vmatpush1.bf16.msra.mxu0 %v3198_v44  ;;  %v3206_v58 = vpack.c.bf16 %v3474_v48, %v3472_v20  ;;  %964 = vmatprep.mubr.f32.mxu0 %v3860_v19  ;;  %3495 = vtanh.f32 %v596_v38  ;;  %v614_v40 = vadd.f32 %v4085_v60, %v530_v36  ;;  %v532_v12 = vmul.f32 %v4236_v13, %v4070_v51 }
  0xc3   : > { %v3478_v3 = vpop.eup %3477  ;;  %3103 = vmatmul.mubr.msk.f32.gmra.mrb[6].mxu1 %vm709_vm0, %v4275_v26  ;;  %3497 = vtanh.f32 %v612_v0  ;;  %v598_v31 = vadd.f32 %v4087_v61, %v514_v59  ;;  %v600_v20 = vadd.f32 %v4087_v61, %v516_v42  ;;  %v513_v44 = vmul.f32 %v4255_v63, %v4072_v52  ;;  %v4425_v59 = vpop.permute.xlu1 %696 }
  0xc4   : > { %v3480_v22 = vpop.eup %3479  ;;  %3207 = vmatpush1.bf16.msra.mxu1 %v3206_v58  ;;  %v3208_v6 = vpack.c.bf16 %v3478_v3, %v3476_v53  ;;  %1053 = vmatprep.mubr.f32.mxu1 %v3860_v19  ;;  %3499 = vtanh.f32 %v593_v45  ;;  %v616_v46 = vadd.f32 %v4085_v60, %v532_v12  ;;  %v529_v13 = vmul.f32 %v4255_v63, %v4070_v51 }
  0xc5   : > { %v3482_v23 = vpop.eup %3481  ;;  %3104 = vmatmul.mubr.msk.f32.vlgmr.msra.gmra.mrb[8].mxu0 %vm709_vm0, %v4193_v37  ;;  %3501 = vtanh.f32 %v609_v5  ;;  %v597_v49 = vadd.f32 %v4087_v61, %v513_v44  ;;  %v531_v63 = vmul.f32 %v4269_v35, %v4070_v51  ;;  %v599_v3 = vadd.f32 %v4087_v61, %v515_v50 }
  0xc6   : > { %v3484_v55 = vpop.eup %3483  ;;  %3209 = vmatprep.subr.bf16.mxu0 %v3208_v6  ;;  %v3216_v14 = vpack.c.bf16 %v3482_v23, %v3480_v22  ;;  %970 = vmatprep.mubr.f32.mxu0 %v3860_v19  ;;  %3503 = vtanh.f32 %v595_v62  ;;  %v613_v58 = vadd.f32 %v4085_v60, %v529_v13 }
  0xc7   : > { %v3486_v47 = vpop.eup %3485  ;;  %3108 = vmatmul.mubr.msk.f32.vlgmr.msra.gmra.mrb[8].mxu1 %vm709_vm0, %v4193_v37  ;;  %3505 = vtanh.f32 %v611_v57  ;;  %v615_v52 = vadd.f32 %v4085_v60, %v531_v63  ;;  %v4437_v13 = vpop.permute.xlu1 %706 }
  0xc8   : > { %v3488_v27 = vpop.eup %3487  ;;  %3217 = vmatprep.subr.bf16.mxu1 %v3216_v14  ;;  %v3210_v28 = vpack.c.bf16 %v3486_v47, %v3484_v55  ;;  %1059 = vmatprep.mubr.f32.mxu1 %v3860_v19  ;;  %3507 = vtanh.f32 %v566_v8 }
  0xc9   : > { %v3490_v30 = vpop.eup %3489  ;;  %3105 = vmatmul.mubr.msk.f32.gmra.mrb[10].mxu0 %vm709_vm0, %v4213_v2  ;;  %3509 = vtanh.f32 %v582_v10 }
  0xca   : > { %v3492_v33 = vpop.eup %3491  ;;  %3211 = vmatpush1.bf16.msra.mxu0 %v3210_v28  ;;  %v3218_v34 = vpack.c.bf16 %v3490_v30, %v3488_v27  ;;  %3511 = vtanh.f32 %v568_v15  ;;  %976 = vmatprep.mubr.f32.mxu0 %v3860_v19 }
  0xcb   : > { %v3494_v56 = vpop.eup %3493  ;;  %3109 = vmatmul.mubr.msk.f32.gmra.mrb[10].mxu1 %vm709_vm0, %v4213_v2  ;;  %3513 = vtanh.f32 %v584_v18 }
  0xcc   : > { %v3496_v38 = vpop.eup %3495  ;;  %3219 = vmatpush1.bf16.msra.mxu1 %v3218_v34  ;;  %v3212_v25 = vpack.c.bf16 %v3494_v56, %v3492_v33  ;;  %1065 = vmatprep.mubr.f32.mxu1 %v3860_v19  ;;  %3515 = vtanh.f32 %v565_v29 }
  0xcd   : > { %v3498_v0 = vpop.eup %3497  ;;  %3106 = vmatmul.mubr.msk.f32.gmra.mrb[12].mxu0 %vm709_vm0, %v4242_v16  ;;  %3517 = vtanh.f32 %v581_v32 }
  0xce   : > { %v3500_v39 = vpop.eup %3499  ;;  %3213 = vmatprep.subr.bf16.mxu0 %v3212_v25  ;;  %v3220_v43 = vpack.c.bf16 %v3498_v0, %v3496_v38  ;;  %982 = vmatprep.mubr.f32.mxu0 %v3860_v19  ;;  %3519 = vtanh.f32 %v567_v41 }
  0xcf   : > { %v3502_v45 = vpop.eup %3501  ;;  %3110 = vmatmul.mubr.msk.f32.gmra.mrb[12].mxu1 %vm709_vm0, %v4242_v16  ;;  %3521 = vtanh.f32 %v583_v7 }
  0xd0   : > { %v3504_v48 = vpop.eup %3503  ;;  %3221 = vmatprep.subr.bf16.mxu1 %v3220_v43  ;;  %v3214_v5 = vpack.c.bf16 %v3502_v45, %v3500_v39  ;;  %1071 = vmatprep.mubr.f32.mxu1 %v3860_v19  ;;  %3523 = vtanh.f32 %v598_v31 }
  0xd1   : > { %v3506_v53 = vpop.eup %3505  ;;  %3107 = vmatmul.mubr.msk.f32.gmra.mrb[14].mxu0 %vm709_vm0, %v4275_v26  ;;  %3525 = vtanh.f32 %v614_v40 }
  0xd2   : > { %v3508_v62 = vpop.eup %3507  ;;  %3215 = vmatpush1.bf16.msra.mxu0 %v3214_v5  ;;  %v3222_v1 = vpack.c.bf16 %v3506_v53, %v3504_v48  ;;  %1142 = vmatprep.mubr.f32.mxu0 %v3860_v19  ;;  %3527 = vtanh.f32 %v600_v20 }
  0xd3   : > { %v3510_v57 = vpop.eup %3509  ;;  %3111 = vmatmul.mubr.msk.f32.gmra.mrb[14].mxu1 %vm709_vm0, %v4275_v26  ;;  %3529 = vtanh.f32 %v616_v46 }
  0xd4   : > { %v3512_v4 = vpop.eup %3511  ;;  %3223 = vmatpush1.bf16.msra.mxu1 %v3222_v1  ;;  %v3224_v22 = vpack.c.bf16 %v3510_v57, %v3508_v62  ;;  %1231 = vmatprep.mubr.f32.mxu1 %v3860_v19  ;;  %3531 = vtanh.f32 %v597_v49 }
  0xd5   : > { %v3514_v51 = vpop.eup %3513  ;;  %3112 = vmatmul.mubr.msk.f32.vlgmr.msra.gmra.mrb[16].mxu0 %vm709_vm0, %v4193_v37  ;;  %3533 = vtanh.f32 %v613_v58 }
  0xd6   : > { %v3516_v35 = vpop.eup %3515  ;;  %3225 = vmatprep.subr.bf16.mxu0 %v3224_v22  ;;  %v3232_v61 = vpack.c.bf16 %v3514_v51, %v3512_v4  ;;  %1148 = vmatprep.mubr.f32.mxu0 %v3860_v19  ;;  %3535 = vtanh.f32 %v599_v3 }
  0xd7   : > { %v3518_v6 = vpop.eup %3517  ;;  %3116 = vmatmul.mubr.msk.f32.vlgmr.msra.gmra.mrb[16].mxu1 %vm709_vm0, %v4193_v37  ;;  %3537 = vtanh.f32 %v615_v52 }
  0xd8   : > { %v3520_v60 = vpop.eup %3519  ;;  %3233 = vmatprep.subr.bf16.mxu1 %v3232_v61  ;;  %v3226_v8 = vpack.c.bf16 %v3518_v6, %v3516_v35  ;;  %1237 = vmatprep.mubr.f32.mxu1 %v3860_v19 }
  0xd9   : > { %v3522_v9 = vpop.eup %3521  ;;  %3113 = vmatmul.mubr.msk.f32.gmra.mrb[18].mxu0 %vm709_vm0, %v4213_v2 }
  0xda   : > { %v3524_v23 = vpop.eup %3523  ;;  %3227 = vmatpush1.bf16.msra.mxu0 %v3226_v8  ;;  %v3234_v10 = vpack.c.bf16 %v3522_v9, %v3520_v60  ;;  %1154 = vmatprep.mubr.f32.mxu0 %v3860_v19 }
  0xdb   : > { %v3526_v11 = vpop.eup %3525  ;;  %3117 = vmatmul.mubr.msk.f32.gmra.mrb[18].mxu1 %vm709_vm0, %v4213_v2 }
  0xdc   : > { %v3528_v55 = vpop.eup %3527  ;;  %3235 = vmatpush1.bf16.msra.mxu1 %v3234_v10  ;;  %v3228_v14 = vpack.c.bf16 %v3526_v11, %v3524_v23  ;;  %1243 = vmatprep.mubr.f32.mxu1 %v3860_v19 }
  0xdd   : > { %v3530_v15 = vpop.eup %3529  ;;  %3114 = vmatmul.mubr.msk.f32.gmra.mrb[20].mxu0 %vm709_vm0, %v4242_v16 }
  0xde   : > { %v3532_v17 = vpop.eup %3531  ;;  %3229 = vmatprep.subr.bf16.mxu0 %v3228_v14  ;;  %v3236_v47 = vpack.c.bf16 %v3530_v15, %v3528_v55  ;;  %1160 = vmatprep.mubr.f32.mxu0 %v3860_v19 }
  0xdf   : > { %v3534_v18 = vpop.eup %3533  ;;  %3118 = vmatmul.mubr.msk.f32.gmra.mrb[20].mxu1 %vm709_vm0, %v4242_v16 }
  0xe0   : > { %v3536_v54 = vpop.eup %3535  ;;  %3237 = vmatprep.subr.bf16.mxu1 %v3236_v47  ;;  %v3230_v27 = vpack.c.bf16 %v3534_v18, %v3532_v17  ;;  %1249 = vmatprep.mubr.f32.mxu1 %v3860_v19 }
  0xe1   : > { %v3538_v28 = vpop.eup %3537  ;;  %3115 = vmatmul.mubr.msk.f32.gmra.mrb[22].mxu0 %vm709_vm0, %v4275_v26 }
  0xe2   : > { %3231 = vmatpush1.bf16.msra.mxu0 %v3230_v27  ;;  %v3238_v29 = vpack.c.bf16 %v3538_v28, %v3536_v54  ;;  %1320 = vmatprep.mubr.f32.mxu0 %v3860_v19 }
  0xe3   : > { %3119 = vmatmul.mubr.msk.f32.gmra.mrb[22].mxu1 %vm709_vm0, %v4275_v26 }
  0xe4   : > { %3239 = vmatpush1.bf16.msra.mxu1 %v3238_v29  ;;  %1409 = vmatprep.mubr.f32.mxu1 %v3860_v19 }
  0xe5   : > { %3120 = vmatmul.mubr.msk.f32.vlgmr.msra.gmra.mrb[24].mxu0 %vm709_vm0, %v4193_v37 }
  0xe6   : > { %1326 = vmatprep.mubr.f32.mxu0 %v3860_v19 }
  0xe7   : > { %3124 = vmatmul.mubr.msk.f32.vlgmr.msra.gmra.mrb[24].mxu1 %vm709_vm0, %v4193_v37  ;;  %v4420_v37 = vpop.permute.xlu0 %691 }
  0xe8   : > { %1415 = vmatprep.mubr.f32.mxu1 %v3860_v19 }
  0xe9   : > { %3121 = vmatmul.mubr.msk.f32.gmra.mrb[26].mxu0 %vm709_vm0, %v4213_v2 }
  0xea   : > { %1332 = vmatprep.mubr.f32.mxu0 %v3860_v19 }
  0xeb   : > { %3125 = vmatmul.mubr.msk.f32.gmra.mrb[26].mxu1 %vm709_vm0, %v4213_v2  ;;  %v4431_v0 = vpop.permute.xlu0 %701 }
  0xec   : > { %1421 = vmatprep.mubr.f32.mxu1 %v3860_v19 }
  0xed   : > { %3122 = vmatmul.mubr.msk.f32.gmra.mrb[28].mxu0 %vm709_vm0, %v4242_v16 }
  0xee   : > { %1338 = vmatprep.mubr.f32.mxu0 %v3860_v19 }
  0xef   : > { %3126 = vmatmul.mubr.msk.f32.gmra.mrb[28].mxu1 %vm709_vm0, %v4242_v16 }
  0xf0   : > { %1427 = vmatprep.mubr.f32.mxu1 %v3860_v19 }
  0xf1   : > { %3123 = vmatmul.mubr.msk.f32.gmra.mrb[30].mxu0 %vm709_vm0, %v4275_v26 }
  0xf2   : > { %1602 = vmatprep.mubr.f32.mxu0 %v3860_v19 }
  0xf3   : > { %3127 = vmatmul.mubr.msk.f32.gmra.mrb[30].mxu1 %vm709_vm0, %v4275_v26 }
  0xf4   : > { %1691 = vmatprep.mubr.f32.mxu1 %v3860_v19 }
 0x188   : > { %v788_v2 = vpop.f32.mrb[0].mxu0 }
 0x189   : > { %v789_v30 = vadd.f32 %v788_v2, %v4420_v37  ;;  %v790_v32 = vpop.f32.mrb[1].mxu0 }
 0x18a   : > { %v877_v33 = vpop.f32.mrb[0].mxu1  ;;  %v791_v16 = vadd.f32 %v790_v32, %v4420_v37 }
 0x18b   : > { %3539 = vtanh.f32 %v789_v30  ;;  %v878_v34 = vadd.f32 %v877_v33, %v4420_v37  ;;  %v879_v41 = vpop.f32.mrb[1].mxu1 }
 0x18c   : > { %3541 = vtanh.f32 %v791_v16  ;;  %v880_v26 = vadd.f32 %v879_v41, %v4420_v37  ;;  %v794_v56 = vpop.f32.mrb[2].mxu0 }
 0x18d   : > { %3543 = vtanh.f32 %v878_v34  ;;  %v795_v7 = vadd.f32 %v794_v56, %v4425_v59  ;;  %v796_v36 = vpop.f32.mrb[3].mxu0 }
 0x18e   : > { %3545 = vtanh.f32 %v880_v26  ;;  %v883_v38 = vpop.f32.mrb[2].mxu1  ;;  %v797_v25 = vadd.f32 %v796_v36, %v4425_v59 }
 0x18f   : > { %3547 = vtanh.f32 %v795_v7  ;;  %v884_v31 = vadd.f32 %v883_v38, %v4425_v59  ;;  %v885_v42 = vpop.f32.mrb[3].mxu1 }
 0x190   : > { %3549 = vtanh.f32 %v797_v25  ;;  %v886_v40 = vadd.f32 %v885_v42, %v4425_v59  ;;  %v800_v12 = vpop.f32.mrb[4].mxu0 }
 0x191   : > { %3551 = vtanh.f32 %v884_v31  ;;  %v801_v39 = vadd.f32 %v800_v12, %v4431_v0  ;;  %v802_v43 = vpop.f32.mrb[5].mxu0 }
 0x192   : > { %3553 = vtanh.f32 %v886_v40  ;;  %v889_v20 = vpop.f32.mrb[4].mxu1  ;;  %v803_v44 = vadd.f32 %v802_v43, %v4431_v0 }
 0x193   : > { %3555 = vtanh.f32 %v801_v39  ;;  %v890_v45 = vadd.f32 %v889_v20, %v4431_v0  ;;  %v891_v46 = vpop.f32.mrb[5].mxu1 }
 0x194   : > { %3557 = vtanh.f32 %v803_v44  ;;  %v892_v48 = vadd.f32 %v891_v46, %v4431_v0  ;;  %v806_v5 = vpop.f32.mrb[6].mxu0 }
 0x195   : > { %v3540_v49 = vpop.eup %3539  ;;  %3559 = vtanh.f32 %v890_v45  ;;  %v807_v50 = vadd.f32 %v806_v5, %v4437_v13  ;;  %v808_v53 = vpop.f32.mrb[7].mxu0 }
 0x196   : > { %v3542_v58 = vpop.eup %3541  ;;  %3561 = vtanh.f32 %v892_v48  ;;  %v895_v63 = vpop.f32.mrb[6].mxu1  ;;  %v809_v62 = vadd.f32 %v808_v53, %v4437_v13 }
 0x197   : > { %v3544_v1 = vpop.eup %3543  ;;  %3563 = vtanh.f32 %v807_v50  ;;  %v896_v3 = vadd.f32 %v895_v63, %v4437_v13  ;;  %v897_v57 = vpop.f32.mrb[7].mxu1 }
 0x198   : > { %v3546_v52 = vpop.eup %3545  ;;  %3565 = vtanh.f32 %v809_v62  ;;  %v898_v4 = vadd.f32 %v897_v57, %v4437_v13  ;;  %v966_v22 = vpop.f32.mrb[8].mxu0  ;;  %v4461_v62 = vld [vmem:[%s4778_s5] sm:$0xff] }
 0x199   : > { %v3548_v51 = vpop.eup %3547  ;;  %3567 = vtanh.f32 %v896_v3  ;;  %v967_v35 = vadd.f32 %v966_v22, %v4420_v37  ;;  %v968_v61 = vpop.f32.mrb[9].mxu0 }
 0x19a   : > { %v3550_v6 = vpop.eup %3549  ;;  %3569 = vtanh.f32 %v898_v4  ;;  %v1055_v60 = vpop.f32.mrb[8].mxu1  ;;  %v969_v8 = vadd.f32 %v968_v61, %v4420_v37  ;;  %v3242_v9 = vpack.c.bf16 %v3548_v51, %v3540_v49 }
 0x19b   : > { %v3552_v23 = vpop.eup %3551  ;;  %3571 = vtanh.f32 %v967_v35  ;;  %v1056_v10 = vadd.f32 %v1055_v60, %v4420_v37  ;;  %v1057_v11 = vpop.f32.mrb[9].mxu1  ;;  %v3240_v55 = vpack.c.bf16 %v3550_v6, %v3542_v58 }
 0x19c   : > { %v3554_v14 = vpop.eup %3553  ;;  %3573 = vtanh.f32 %v969_v8  ;;  %v1058_v15 = vadd.f32 %v1057_v11, %v4420_v37  ;;  %v972_v17 = vpop.f32.mrb[10].mxu0  ;;  %v3250_v47 = vpack.c.bf16 %v3552_v23, %v3544_v1 }
 0x19d   : > { %v3556_v18 = vpop.eup %3555  ;;  %3575 = vtanh.f32 %v1056_v10  ;;  %v973_v54 = vadd.f32 %v972_v17, %v4425_v59  ;;  %v974_v27 = vpop.f32.mrb[11].mxu0  ;;  %3241 = vmatprep.subr.bf16.mxu0 %v3240_v55  ;;  %v3248_v28 = vpack.c.bf16 %v3554_v14, %v3546_v52 }
 0x19e   : > { %v3558_v29 = vpop.eup %3557  ;;  %3577 = vtanh.f32 %v1058_v15  ;;  %v1061_v2 = vpop.f32.mrb[10].mxu1  ;;  %v975_v30 = vadd.f32 %v974_v27, %v4425_v59  ;;  %3243 = vmatpush1.bf16.msra.mxu0 %v3242_v9  ;;  %v4473_v9 = vld [vmem:[%s4778_s5 + $0x8] sm:$0xff] }
 0x19f   : > { %v3560_v32 = vpop.eup %3559  ;;  %3579 = vtanh.f32 %v973_v54  ;;  %v1062_v33 = vadd.f32 %v1061_v2, %v4425_v59  ;;  %v1063_v16 = vpop.f32.mrb[11].mxu1  ;;  %3249 = vmatprep.subr.bf16.mxu1 %v3248_v28 }
 0x1a0   : > { %v3562_v34 = vpop.eup %3561  ;;  %3581 = vtanh.f32 %v975_v30  ;;  %v1064_v41 = vadd.f32 %v1063_v16, %v4425_v59  ;;  %3251 = vmatpush1.bf16.msra.mxu1 %v3250_v47  ;;  %v978_v26 = vpop.f32.mrb[12].mxu0 }
 0x1a1   : > { %v3564_v56 = vpop.eup %3563  ;;  %3583 = vtanh.f32 %v1062_v33  ;;  %v979_v7 = vadd.f32 %v978_v26, %v4431_v0  ;;  %v980_v36 = vpop.f32.mrb[13].mxu0  ;;  %v4488_v33 = vld [vmem:[%s4778_s5 + $0x10] sm:$0xff] }
 0x1a2   : > { %v3566_v38 = vpop.eup %3565  ;;  %3585 = vtanh.f32 %v1064_v41  ;;  %v1067_v25 = vpop.f32.mrb[12].mxu1  ;;  %v981_v31 = vadd.f32 %v980_v36, %v4431_v0  ;;  %v3246_v42 = vpack.c.bf16 %v3564_v56, %v3556_v18 }
 0x1a3   : > { %v3568_v40 = vpop.eup %3567  ;;  %3587 = vtanh.f32 %v979_v7  ;;  %v1068_v12 = vadd.f32 %v1067_v25, %v4431_v0  ;;  %v1069_v39 = vpop.f32.mrb[13].mxu1  ;;  %v3244_v43 = vpack.c.bf16 %v3566_v38, %v3558_v29 }
 0x1a4   : > { %v3570_v20 = vpop.eup %3569  ;;  %3589 = vtanh.f32 %v981_v31  ;;  %v1070_v44 = vadd.f32 %v1069_v39, %v4431_v0  ;;  %v984_v45 = vpop.f32.mrb[14].mxu0  ;;  %v3254_v46 = vpack.c.bf16 %v3568_v40, %v3560_v32 }
 0x1a5   : > { %v3572_v48 = vpop.eup %3571  ;;  %3591 = vtanh.f32 %v1068_v12  ;;  %v985_v5 = vadd.f32 %v984_v45, %v4437_v13  ;;  %v986_v49 = vpop.f32.mrb[15].mxu0  ;;  %3245 = vmatprep.subr.bf16.mxu0 %v3244_v43  ;;  %v3252_v50 = vpack.c.bf16 %v3570_v20, %v3562_v34  ;;  %v4503_v12 = vld [vmem:[%s4778_s5 + $0x18] sm:$0xff] }
 0x1a6   : > { %v3574_v53 = vpop.eup %3573  ;;  %3593 = vtanh.f32 %v1070_v44  ;;  %v1073_v58 = vpop.f32.mrb[14].mxu1  ;;  %v987_v63 = vadd.f32 %v986_v49, %v4437_v13  ;;  %3247 = vmatpush1.bf16.msra.mxu0 %v3246_v42 }
 0x1a7   : > { %v3576_v1 = vpop.eup %3575  ;;  %3595 = vtanh.f32 %v985_v5  ;;  %v1074_v3 = vadd.f32 %v1073_v58, %v4437_v13  ;;  %v1075_v57 = vpop.f32.mrb[15].mxu1  ;;  %3253 = vmatprep.subr.bf16.mxu1 %v3252_v50 }
 0x1a8   : > { %v3578_v52 = vpop.eup %3577  ;;  %3597 = vtanh.f32 %v987_v63  ;;  %v1076_v4 = vadd.f32 %v1075_v57, %v4437_v13  ;;  %3255 = vmatpush1.bf16.msra.mxu1 %v3254_v46  ;;  %v1144_v22 = vpop.f32.mrb[16].mxu0 }
 0x1a9   : > { %v3580_v51 = vpop.eup %3579  ;;  %3599 = vtanh.f32 %v1074_v3  ;;  %v1145_v35 = vadd.f32 %v1144_v22, %v4420_v37  ;;  %v1146_v61 = vpop.f32.mrb[17].mxu0  ;;  %3128 = vmatmul.mubr.msk.f32.vlgmr.msra.gmra.mrb[32].mxu0 %vm709_vm0, %v4461_v62 }
 0x1aa   : > { %v3582_v6 = vpop.eup %3581  ;;  %3601 = vtanh.f32 %v1076_v4  ;;  %v1233_v60 = vpop.f32.mrb[16].mxu1  ;;  %v1147_v8 = vadd.f32 %v1146_v61, %v4420_v37  ;;  %1608 = vmatprep.mubr.f32.mxu0 %v3860_v19  ;;  %v3258_v23 = vpack.c.bf16 %v3580_v51, %v3572_v48 }
 0x1ab   : > { %v3584_v10 = vpop.eup %3583  ;;  %3603 = vtanh.f32 %v1145_v35  ;;  %v1234_v11 = vadd.f32 %v1233_v60, %v4420_v37  ;;  %v1235_v55 = vpop.f32.mrb[17].mxu1  ;;  %3132 = vmatmul.mubr.msk.f32.vlgmr.msra.gmra.mrb[32].mxu1 %vm709_vm0, %v4461_v62  ;;  %v3256_v14 = vpack.c.bf16 %v3582_v6, %v3574_v53 }
 0x1ac   : > { %v3586_v15 = vpop.eup %3585  ;;  %3605 = vtanh.f32 %v1147_v8  ;;  %v1236_v17 = vadd.f32 %v1235_v55, %v4420_v37  ;;  %v1150_v47 = vpop.f32.mrb[18].mxu0  ;;  %1697 = vmatprep.mubr.f32.mxu1 %v3860_v19  ;;  %v3266_v18 = vpack.c.bf16 %v3584_v10, %v3576_v1 }
 0x1ad   : > { %v3588_v54 = vpop.eup %3587  ;;  %3607 = vtanh.f32 %v1234_v11  ;;  %v1151_v27 = vadd.f32 %v1150_v47, %v4425_v59  ;;  %v1152_v28 = vpop.f32.mrb[19].mxu0  ;;  %3129 = vmatmul.mubr.msk.f32.gmra.mrb[34].mxu0 %vm709_vm0, %v4473_v9  ;;  %3257 = vmatprep.subr.bf16.mxu0 %v3256_v14  ;;  %v3264_v29 = vpack.c.bf16 %v3586_v15, %v3578_v52 }
 0x1ae   : > { %v3590_v2 = vpop.eup %3589  ;;  %3609 = vtanh.f32 %v1236_v17  ;;  %v1239_v30 = vpop.f32.mrb[18].mxu1  ;;  %v1153_v32 = vadd.f32 %v1152_v28, %v4425_v59  ;;  %3259 = vmatpush1.bf16.msra.mxu0 %v3258_v23  ;;  %1614 = vmatprep.mubr.f32.mxu0 %v3860_v19 }
 0x1af   : > { %v3592_v16 = vpop.eup %3591  ;;  %3611 = vtanh.f32 %v1151_v27  ;;  %v1240_v34 = vadd.f32 %v1239_v30, %v4425_v59  ;;  %v1241_v41 = vpop.f32.mrb[19].mxu1  ;;  %3133 = vmatmul.mubr.msk.f32.gmra.mrb[34].mxu1 %vm709_vm0, %v4473_v9  ;;  %3265 = vmatprep.subr.bf16.mxu1 %v3264_v29 }
 0x1b0   : > { %v3594_v26 = vpop.eup %3593  ;;  %3613 = vtanh.f32 %v1153_v32  ;;  %v1242_v56 = vadd.f32 %v1241_v41, %v4425_v59  ;;  %3267 = vmatpush1.bf16.msra.mxu1 %v3266_v18  ;;  %v1156_v7 = vpop.f32.mrb[20].mxu0  ;;  %1703 = vmatprep.mubr.f32.mxu1 %v3860_v19 }
 0x1b1   : > { %v3596_v36 = vpop.eup %3595  ;;  %3615 = vtanh.f32 %v1240_v34  ;;  %v1157_v38 = vadd.f32 %v1156_v7, %v4431_v0  ;;  %v1158_v25 = vpop.f32.mrb[21].mxu0  ;;  %3130 = vmatmul.mubr.msk.f32.gmra.mrb[36].mxu0 %vm709_vm0, %v4488_v33 }
 0x1b2   : > { %v3598_v31 = vpop.eup %3597  ;;  %3617 = vtanh.f32 %v1242_v56  ;;  %v1245_v42 = vpop.f32.mrb[20].mxu1  ;;  %v1159_v40 = vadd.f32 %v1158_v25, %v4431_v0  ;;  %1620 = vmatprep.mubr.f32.mxu0 %v3860_v19  ;;  %v3262_v39 = vpack.c.bf16 %v3596_v36, %v3588_v54 }
 0x1b3   : > { %v3600_v43 = vpop.eup %3599  ;;  %3619 = vtanh.f32 %v1157_v38  ;;  %v1246_v20 = vadd.f32 %v1245_v42, %v4431_v0  ;;  %v1247_v44 = vpop.f32.mrb[21].mxu1  ;;  %3134 = vmatmul.mubr.msk.f32.gmra.mrb[36].mxu1 %vm709_vm0, %v4488_v33  ;;  %v3260_v45 = vpack.c.bf16 %v3598_v31, %v3590_v2 }
 0x1b4   : > { %v3602_v46 = vpop.eup %3601  ;;  %3621 = vtanh.f32 %v1159_v40  ;;  %v1248_v48 = vadd.f32 %v1247_v44, %v4431_v0  ;;  %v1162_v5 = vpop.f32.mrb[22].mxu0  ;;  %1709 = vmatprep.mubr.f32.mxu1 %v3860_v19  ;;  %v3270_v49 = vpack.c.bf16 %v3600_v43, %v3592_v16 }
 0x1b5   : > { %v3604_v50 = vpop.eup %3603  ;;  %3623 = vtanh.f32 %v1246_v20  ;;  %v1163_v53 = vadd.f32 %v1162_v5, %v4437_v13  ;;  %v1164_v58 = vpop.f32.mrb[23].mxu0  ;;  %3131 = vmatmul.mubr.msk.f32.gmra.mrb[38].mxu0 %vm709_vm0, %v4503_v12  ;;  %3261 = vmatprep.subr.bf16.mxu0 %v3260_v45  ;;  %v3268_v63 = vpack.c.bf16 %v3602_v46, %v3594_v26 }
 0x1b6   : > { %v3606_v1 = vpop.eup %3605  ;;  %3625 = vtanh.f32 %v1248_v48  ;;  %v1251_v3 = vpop.f32.mrb[22].mxu1  ;;  %v1165_v57 = vadd.f32 %v1164_v58, %v4437_v13  ;;  %3263 = vmatpush1.bf16.msra.mxu0 %v3262_v39  ;;  %1780 = vmatprep.mubr.f32.mxu0 %v3860_v19 }
 0x1b7   : > { %v3608_v52 = vpop.eup %3607  ;;  %3627 = vtanh.f32 %v1163_v53  ;;  %v1252_v4 = vadd.f32 %v1251_v3, %v4437_v13  ;;  %v1253_v22 = vpop.f32.mrb[23].mxu1  ;;  %3135 = vmatmul.mubr.msk.f32.gmra.mrb[38].mxu1 %vm709_vm0, %v4503_v12  ;;  %3269 = vmatprep.subr.bf16.mxu1 %v3268_v63 }
 0x1b8   : > { %v3610_v51 = vpop.eup %3609  ;;  %3629 = vtanh.f32 %v1165_v57  ;;  %v1254_v35 = vadd.f32 %v1253_v22, %v4437_v13  ;;  %3271 = vmatpush1.bf16.msra.mxu1 %v3270_v49  ;;  %v1322_v61 = vpop.f32.mrb[24].mxu0  ;;  %1869 = vmatprep.mubr.f32.mxu1 %v3860_v19 }
 0x1b9   : > { %v3612_v6 = vpop.eup %3611  ;;  %3631 = vtanh.f32 %v1252_v4  ;;  %v1323_v60 = vadd.f32 %v1322_v61, %v4420_v37  ;;  %v1324_v8 = vpop.f32.mrb[25].mxu0  ;;  %3136 = vmatmul.mubr.msk.f32.vlgmr.msra.gmra.mrb[40].mxu0 %vm709_vm0, %v4461_v62 }
 0x1ba   : > { %v3614_v23 = vpop.eup %3613  ;;  %3633 = vtanh.f32 %v1254_v35  ;;  %v1411_v10 = vpop.f32.mrb[24].mxu1  ;;  %v1325_v11 = vadd.f32 %v1324_v8, %v4420_v37  ;;  %1786 = vmatprep.mubr.f32.mxu0 %v3860_v19  ;;  %v3274_v55 = vpack.c.bf16 %v3612_v6, %v3604_v50 }
 0x1bb   : > { %v3616_v14 = vpop.eup %3615  ;;  %3635 = vtanh.f32 %v1323_v60  ;;  %v1412_v15 = vadd.f32 %v1411_v10, %v4420_v37  ;;  %v1413_v17 = vpop.f32.mrb[25].mxu1  ;;  %3140 = vmatmul.mubr.msk.f32.vlgmr.msra.gmra.mrb[40].mxu1 %vm709_vm0, %v4461_v62  ;;  %v3272_v47 = vpack.c.bf16 %v3614_v23, %v3606_v1 }
 0x1bc   : > { %v3618_v18 = vpop.eup %3617  ;;  %3637 = vtanh.f32 %v1325_v11  ;;  %v1414_v54 = vadd.f32 %v1413_v17, %v4420_v37  ;;  %v1328_v27 = vpop.f32.mrb[26].mxu0  ;;  %1875 = vmatprep.mubr.f32.mxu1 %v3860_v19  ;;  %v3282_v28 = vpack.c.bf16 %v3616_v14, %v3608_v52 }
 0x1bd   : > { %v3620_v29 = vpop.eup %3619  ;;  %3639 = vtanh.f32 %v1412_v15  ;;  %v1329_v2 = vadd.f32 %v1328_v27, %v4425_v59  ;;  %v1330_v30 = vpop.f32.mrb[27].mxu0  ;;  %3137 = vmatmul.mubr.msk.f32.gmra.mrb[42].mxu0 %vm709_vm0, %v4473_v9  ;;  %3273 = vmatprep.subr.bf16.mxu0 %v3272_v47  ;;  %v3280_v32 = vpack.c.bf16 %v3618_v18, %v3610_v51 }
 0x1be   : > { %v3622_v16 = vpop.eup %3621  ;;  %3641 = vtanh.f32 %v1414_v54  ;;  %v1417_v34 = vpop.f32.mrb[26].mxu1  ;;  %v1331_v41 = vadd.f32 %v1330_v30, %v4425_v59  ;;  %3275 = vmatpush1.bf16.msra.mxu0 %v3274_v55  ;;  %1792 = vmatprep.mubr.f32.mxu0 %v3860_v19 }
 0x1bf   : > { %v3624_v37 = vpop.eup %3623  ;;  %3643 = vtanh.f32 %v1329_v2  ;;  %v1418_v26 = vadd.f32 %v1417_v34, %v4425_v59  ;;  %v1419_v56 = vpop.f32.mrb[27].mxu1  ;;  %3141 = vmatmul.mubr.msk.f32.gmra.mrb[42].mxu1 %vm709_vm0, %v4473_v9  ;;  %3281 = vmatprep.subr.bf16.mxu1 %v3280_v32 }
 0x1c0   : > { %v3626_v7 = vpop.eup %3625  ;;  %3645 = vtanh.f32 %v1331_v41  ;;  %v1420_v36 = vadd.f32 %v1419_v56, %v4425_v59  ;;  %3283 = vmatpush1.bf16.msra.mxu1 %v3282_v28  ;;  %v1334_v38 = vpop.f32.mrb[28].mxu0  ;;  %1881 = vmatprep.mubr.f32.mxu1 %v3860_v19 }
 0x1c1   : > { %v3628_v25 = vpop.eup %3627  ;;  %3647 = vtanh.f32 %v1418_v26  ;;  %v1335_v31 = vadd.f32 %v1334_v38, %v4431_v0  ;;  %v1336_v42 = vpop.f32.mrb[29].mxu0  ;;  %3138 = vmatmul.mubr.msk.f32.gmra.mrb[44].mxu0 %vm709_vm0, %v4488_v33 }
 0x1c2   : > { %v3630_v40 = vpop.eup %3629  ;;  %3649 = vtanh.f32 %v1420_v36  ;;  %v1423_v39 = vpop.f32.mrb[28].mxu1  ;;  %v1337_v43 = vadd.f32 %v1336_v42, %v4431_v0  ;;  %1798 = vmatprep.mubr.f32.mxu0 %v3860_v19  ;;  %v3278_v59 = vpack.c.bf16 %v3628_v25, %v3620_v29 }
 0x1c3   : > { %v3632_v20 = vpop.eup %3631  ;;  %3651 = vtanh.f32 %v1335_v31  ;;  %v1424_v44 = vadd.f32 %v1423_v39, %v4431_v0  ;;  %v1425_v45 = vpop.f32.mrb[29].mxu1  ;;  %3142 = vmatmul.mubr.msk.f32.gmra.mrb[44].mxu1 %vm709_vm0, %v4488_v33  ;;  %v3276_v46 = vpack.c.bf16 %v3630_v40, %v3622_v16 }
 0x1c4   : > { %v3634_v48 = vpop.eup %3633  ;;  %3653 = vtanh.f32 %v1337_v43  ;;  %v1426_v5 = vadd.f32 %v1425_v45, %v4431_v0  ;;  %v1340_v49 = vpop.f32.mrb[30].mxu0  ;;  %1887 = vmatprep.mubr.f32.mxu1 %v3860_v19  ;;  %v3286_v50 = vpack.c.bf16 %v3632_v20, %v3624_v37 }
 0x1c5   : > { %v3636_v53 = vpop.eup %3635  ;;  %3655 = vtanh.f32 %v1424_v44  ;;  %v1341_v58 = vadd.f32 %v1340_v49, %v4437_v13  ;;  %v1342_v63 = vpop.f32.mrb[31].mxu0  ;;  %3139 = vmatmul.mubr.msk.f32.gmra.mrb[46].mxu0 %vm709_vm0, %v4503_v12  ;;  %3277 = vmatprep.subr.bf16.mxu0 %v3276_v46  ;;  %v3284_v1 = vpack.c.bf16 %v3634_v48, %v3626_v7 }
 0x1c6   : > { %v3638_v3 = vpop.eup %3637  ;;  %3657 = vtanh.f32 %v1426_v5  ;;  %v1429_v57 = vpop.f32.mrb[30].mxu1  ;;  %v1343_v52 = vadd.f32 %v1342_v63, %v4437_v13  ;;  %3279 = vmatpush1.bf16.msra.mxu0 %v3278_v59  ;;  %1958 = vmatprep.mubr.f32.mxu0 %v3860_v19 }
 0x1c7   : > { %v3640_v0 = vpop.eup %3639  ;;  %3659 = vtanh.f32 %v1341_v58  ;;  %v1430_v4 = vadd.f32 %v1429_v57, %v4437_v13  ;;  %v1431_v22 = vpop.f32.mrb[31].mxu1  ;;  %3143 = vmatmul.mubr.msk.f32.gmra.mrb[46].mxu1 %vm709_vm0, %v4503_v12  ;;  %3285 = vmatprep.subr.bf16.mxu1 %v3284_v1 }
 0x1c8   : > { %v3642_v51 = vpop.eup %3641  ;;  %3661 = vtanh.f32 %v1343_v52  ;;  %v1432_v35 = vadd.f32 %v1431_v22, %v4437_v13  ;;  %3287 = vmatpush1.bf16.msra.mxu1 %v3286_v50  ;;  %2047 = vmatprep.mubr.f32.mxu1 %v3860_v19  ;;  %v4613_v26 = vpop.permute.xlu1 %1513 }
 0x1c9   : > { %v3644_v61 = vpop.eup %3643  ;;  %3663 = vtanh.f32 %v1430_v4  ;;  %3144 = vmatmul.mubr.msk.f32.vlgmr.msra.gmra.mrb[48].mxu0 %vm709_vm0, %v4461_v62 }
 0x1ca   : > { %v3646_v6 = vpop.eup %3645  ;;  %3665 = vtanh.f32 %v1432_v35  ;;  %1964 = vmatprep.mubr.f32.mxu0 %v3860_v19  ;;  %v3290_v60 = vpack.c.bf16 %v3644_v61, %v3636_v53 }
 0x1cb   : > { %v3648_v8 = vpop.eup %3647  ;;  %3148 = vmatmul.mubr.msk.f32.vlgmr.msra.gmra.mrb[48].mxu1 %vm709_vm0, %v4461_v62  ;;  %v3288_v23 = vpack.c.bf16 %v3646_v6, %v3638_v3 }
 0x1cc   : > { %v3650_v10 = vpop.eup %3649  ;;  %2053 = vmatprep.mubr.f32.mxu1 %v3860_v19  ;;  %v3298_v13 = vpack.c.bf16 %v3648_v8, %v3640_v0  ;;  %v4625_v5 = vpop.permute.xlu1 %1523 }
 0x1cd   : > { %v3652_v11 = vpop.eup %3651  ;;  %3145 = vmatmul.mubr.msk.f32.gmra.mrb[50].mxu0 %vm709_vm0, %v4473_v9  ;;  %3289 = vmatprep.subr.bf16.mxu0 %v3288_v23  ;;  %v3296_v55 = vpack.c.bf16 %v3650_v10, %v3642_v51 }
 0x1ce   : > { %v3654_v14 = vpop.eup %3653  ;;  %3291 = vmatpush1.bf16.msra.mxu0 %v3290_v60  ;;  %1970 = vmatprep.mubr.f32.mxu0 %v3860_v19 }
 0x1cf   : > { %v3656_v15 = vpop.eup %3655  ;;  %3149 = vmatmul.mubr.msk.f32.gmra.mrb[50].mxu1 %vm709_vm0, %v4473_v9  ;;  %3297 = vmatprep.subr.bf16.mxu1 %v3296_v55 }
 0x1d0   : > { %v3658_v17 = vpop.eup %3657  ;;  %3299 = vmatpush1.bf16.msra.mxu1 %v3298_v13  ;;  %2059 = vmatprep.mubr.f32.mxu1 %v3860_v19 }
 0x1d1   : > { %v3660_v47 = vpop.eup %3659  ;;  %3146 = vmatmul.mubr.msk.f32.gmra.mrb[52].mxu0 %vm709_vm0, %v4488_v33 }
 0x1d2   : > { %v3662_v18 = vpop.eup %3661  ;;  %1976 = vmatprep.mubr.f32.mxu0 %v3860_v19  ;;  %v3294_v54 = vpack.c.bf16 %v3660_v47, %v3652_v11 }
 0x1d3   : > { %v3664_v27 = vpop.eup %3663  ;;  %3150 = vmatmul.mubr.msk.f32.gmra.mrb[52].mxu1 %vm709_vm0, %v4488_v33  ;;  %v3292_v28 = vpack.c.bf16 %v3662_v18, %v3654_v14 }
 0x1d4   : > { %v3666_v29 = vpop.eup %3665  ;;  %2065 = vmatprep.mubr.f32.mxu1 %v3860_v19  ;;  %v3302_v2 = vpack.c.bf16 %v3664_v27, %v3656_v15 }
 0x1d5   : > { %3147 = vmatmul.mubr.msk.f32.gmra.mrb[54].mxu0 %vm709_vm0, %v4503_v12  ;;  %3293 = vmatprep.subr.bf16.mxu0 %v3292_v28  ;;  %v3300_v30 = vpack.c.bf16 %v3666_v29, %v3658_v17 }
 0x1d6   : > { %3295 = vmatpush1.bf16.msra.mxu0 %v3294_v54  ;;  %2136 = vmatprep.mubr.f32.mxu0 %v3860_v19 }
 0x1d7   : > { %3151 = vmatmul.mubr.msk.f32.gmra.mrb[54].mxu1 %vm709_vm0, %v4503_v12  ;;  %3301 = vmatprep.subr.bf16.mxu1 %v3300_v30 }
 0x1d8   : > { %3303 = vmatpush1.bf16.msra.mxu1 %v3302_v2  ;;  %2225 = vmatprep.mubr.f32.mxu1 %v3860_v19 }
 0x1d9   : > { %3152 = vmatmul.mubr.msk.f32.vlgmr.msra.gmra.mrb[56].mxu0 %vm709_vm0, %v4461_v62 }
 0x1da   : > { %2142 = vmatprep.mubr.f32.mxu0 %v3860_v19 }
 0x1db   : > { %3156 = vmatmul.mubr.msk.f32.vlgmr.msra.gmra.mrb[56].mxu1 %vm709_vm0, %v4461_v62  ;;  %v4608_v62 = vpop.permute.xlu0 %1508 }
 0x1dc   : > { %2231 = vmatprep.mubr.f32.mxu1 %v3860_v19 }
 0x1dd   : > { %3153 = vmatmul.mubr.msk.f32.gmra.mrb[58].mxu0 %vm709_vm0, %v4473_v9 }
 0x1de   : > { %2148 = vmatprep.mubr.f32.mxu0 %v3860_v19 }
 0x1df   : > { %3157 = vmatmul.mubr.msk.f32.gmra.mrb[58].mxu1 %vm709_vm0, %v4473_v9  ;;  %v4619_v40 = vpop.permute.xlu0 %1518 }
 0x1e0   : > { %2237 = vmatprep.mubr.f32.mxu1 %v3860_v19 }
 0x1e1   : > { %3154 = vmatmul.mubr.msk.f32.gmra.mrb[60].mxu0 %vm709_vm0, %v4488_v33 }
 0x1e2   : > { %2154 = vmatprep.mubr.f32.mxu0 %v3860_v19 }
 0x1e3   : > { %3158 = vmatmul.mubr.msk.f32.gmra.mrb[60].mxu1 %vm709_vm0, %v4488_v33 }
 0x1e4   : > { %2243 = vmatprep.mubr.f32.mxu1 %v3860_v19 }
 0x1e5   : > { %3155 = vmatmul.mubr.msk.f32.gmra.mrb[62].mxu0 %vm709_vm0, %v4503_v12 }
 0x1e6   : > { %2392 = vmatprep.mubr.f32.mxu0 %v3860_v19 }
 0x1e7   : > { %3159 = vmatmul.mubr.msk.f32.gmra.mrb[62].mxu1 %vm709_vm0, %v4503_v12 }
 0x1e8   : > { %2463 = vmatprep.mubr.f32.mxu1 %v3860_v19 }
 0x27c   : > { %v1604_v9 = vpop.f32.mrb[32].mxu0 }
 0x27d   : > { %v1605_v32 = vadd.f32 %v1604_v9, %v4608_v62  ;;  %v1606_v16 = vpop.f32.mrb[33].mxu0 }
 0x27e   : > { %v1693_v34 = vpop.f32.mrb[32].mxu1  ;;  %v1607_v33 = vadd.f32 %v1606_v16, %v4608_v62 }
 0x27f   : > { %3667 = vtanh.f32 %v1605_v32  ;;  %v1694_v41 = vadd.f32 %v1693_v34, %v4608_v62  ;;  %v1695_v37 = vpop.f32.mrb[33].mxu1 }
 0x280   : > { %3669 = vtanh.f32 %v1607_v33  ;;  %v1696_v12 = vadd.f32 %v1695_v37, %v4608_v62  ;;  %v1610_v56 = vpop.f32.mrb[34].mxu0 }
 0x281   : > { %3671 = vtanh.f32 %v1694_v41  ;;  %v1611_v7 = vadd.f32 %v1610_v56, %v4613_v26  ;;  %v1612_v36 = vpop.f32.mrb[35].mxu0 }
 0x282   : > { %3673 = vtanh.f32 %v1696_v12  ;;  %v1699_v38 = vpop.f32.mrb[34].mxu1  ;;  %v1613_v25 = vadd.f32 %v1612_v36, %v4613_v26 }
 0x283   : > { %3675 = vtanh.f32 %v1611_v7  ;;  %v1700_v31 = vadd.f32 %v1699_v38, %v4613_v26  ;;  %v1701_v42 = vpop.f32.mrb[35].mxu1 }
 0x284   : > { %3677 = vtanh.f32 %v1613_v25  ;;  %v1702_v39 = vadd.f32 %v1701_v42, %v4613_v26  ;;  %v1616_v43 = vpop.f32.mrb[36].mxu0 }
 0x285   : > { %3679 = vtanh.f32 %v1700_v31  ;;  %v1617_v59 = vadd.f32 %v1616_v43, %v4619_v40  ;;  %v1618_v20 = vpop.f32.mrb[37].mxu0 }
 0x286   : > { %3681 = vtanh.f32 %v1702_v39  ;;  %v1705_v44 = vpop.f32.mrb[36].mxu1  ;;  %v1619_v45 = vadd.f32 %v1618_v20, %v4619_v40 }
 0x287   : > { %3683 = vtanh.f32 %v1617_v59  ;;  %v1706_v46 = vadd.f32 %v1705_v44, %v4619_v40  ;;  %v1707_v48 = vpop.f32.mrb[37].mxu1 }
 0x288   : > { %3685 = vtanh.f32 %v1619_v45  ;;  %v1708_v49 = vadd.f32 %v1707_v48, %v4619_v40  ;;  %v1622_v50 = vpop.f32.mrb[38].mxu0 }
 0x289   : > { %v3668_v53 = vpop.eup %3667  ;;  %3687 = vtanh.f32 %v1706_v46  ;;  %v1623_v58 = vadd.f32 %v1622_v50, %v4625_v5  ;;  %v1624_v63 = vpop.f32.mrb[39].mxu0 }
 0x28a   : > { %v3670_v1 = vpop.eup %3669  ;;  %3689 = vtanh.f32 %v1708_v49  ;;  %v1711_v3 = vpop.f32.mrb[38].mxu1  ;;  %v1625_v57 = vadd.f32 %v1624_v63, %v4625_v5 }
 0x28b   : > { %v3672_v52 = vpop.eup %3671  ;;  %3691 = vtanh.f32 %v1623_v58  ;;  %v1712_v0 = vadd.f32 %v1711_v3, %v4625_v5  ;;  %v1713_v4 = vpop.f32.mrb[39].mxu1 }
 0x28c   : > { %v3674_v22 = vpop.eup %3673  ;;  %3693 = vtanh.f32 %v1625_v57  ;;  %v1714_v51 = vadd.f32 %v1713_v4, %v4625_v5  ;;  %v1782_v35 = vpop.f32.mrb[40].mxu0  ;;  %v4649_v57 = vld [vmem:[%s4780_s7] sm:$0x1] }
 0x28d   : > { %v3676_v61 = vpop.eup %3675  ;;  %3695 = vtanh.f32 %v1712_v0  ;;  %v1783_v6 = vadd.f32 %v1782_v35, %v4608_v62  ;;  %v1784_v60 = vpop.f32.mrb[41].mxu0 }
 0x28e   : > { %v3678_v8 = vpop.eup %3677  ;;  %3697 = vtanh.f32 %v1714_v51  ;;  %v1871_v23 = vpop.f32.mrb[40].mxu1  ;;  %v1785_v10 = vadd.f32 %v1784_v60, %v4608_v62  ;;  %v3306_v13 = vpack.c.bf16 %v3676_v61, %v3668_v53 }
 0x28f   : > { %v3680_v11 = vpop.eup %3679  ;;  %3699 = vtanh.f32 %v1783_v6  ;;  %v1872_v55 = vadd.f32 %v1871_v23, %v4608_v62  ;;  %v1873_v14 = vpop.f32.mrb[41].mxu1  ;;  %v3304_v15 = vpack.c.bf16 %v3678_v8, %v3670_v1 }
 0x290   : > { %v3682_v17 = vpop.eup %3681  ;;  %3701 = vtanh.f32 %v1785_v10  ;;  %v1874_v47 = vadd.f32 %v1873_v14, %v4608_v62  ;;  %v1788_v18 = vpop.f32.mrb[42].mxu0  ;;  %v3314_v54 = vpack.c.bf16 %v3680_v11, %v3672_v52 }
 0x291   : > { %v3684_v27 = vpop.eup %3683  ;;  %3703 = vtanh.f32 %v1872_v55  ;;  %v1789_v28 = vadd.f32 %v1788_v18, %v4613_v26  ;;  %v1790_v29 = vpop.f32.mrb[43].mxu0  ;;  %3305 = vmatprep.subr.bf16.mxu0 %v3304_v15  ;;  %v3312_v2 = vpack.c.bf16 %v3682_v17, %v3674_v22 }
 0x292   : > { %v3686_v30 = vpop.eup %3685  ;;  %3705 = vtanh.f32 %v1874_v47  ;;  %v1877_v9 = vpop.f32.mrb[42].mxu1  ;;  %v1791_v32 = vadd.f32 %v1790_v29, %v4613_v26  ;;  %3307 = vmatpush1.bf16.msra.mxu0 %v3306_v13 }
 0x293   : > { %v3688_v16 = vpop.eup %3687  ;;  %3707 = vtanh.f32 %v1789_v28  ;;  %v1878_v34 = vadd.f32 %v1877_v9, %v4613_v26  ;;  %v1879_v33 = vpop.f32.mrb[43].mxu1  ;;  %3313 = vmatprep.subr.bf16.mxu1 %v3312_v2 }
 0x294   : > { %v3690_v41 = vpop.eup %3689  ;;  %3709 = vtanh.f32 %v1791_v32  ;;  %v1880_v37 = vadd.f32 %v1879_v33, %v4613_v26  ;;  %3315 = vmatpush1.bf16.msra.mxu1 %v3314_v54  ;;  %v1794_v12 = vpop.f32.mrb[44].mxu0 }
 0x295   : > { %v3692_v56 = vpop.eup %3691  ;;  %3711 = vtanh.f32 %v1878_v34  ;;  %v1795_v7 = vadd.f32 %v1794_v12, %v4619_v40  ;;  %v1796_v36 = vpop.f32.mrb[45].mxu0 }
 0x296   : > { %v3694_v38 = vpop.eup %3693  ;;  %3713 = vtanh.f32 %v1880_v37  ;;  %v1883_v25 = vpop.f32.mrb[44].mxu1  ;;  %v1797_v31 = vadd.f32 %v1796_v36, %v4619_v40  ;;  %v3310_v42 = vpack.c.bf16 %v3692_v56, %v3684_v27 }
 0x297   : > { %v3696_v39 = vpop.eup %3695  ;;  %3715 = vtanh.f32 %v1795_v7  ;;  %v1884_v43 = vadd.f32 %v1883_v25, %v4619_v40  ;;  %v1885_v59 = vpop.f32.mrb[45].mxu1  ;;  %v3308_v20 = vpack.c.bf16 %v3694_v38, %v3686_v30 }
 0x298   : > { %v3698_v44 = vpop.eup %3697  ;;  %3717 = vtanh.f32 %v1797_v31  ;;  %v1886_v45 = vadd.f32 %v1885_v59, %v4619_v40  ;;  %v1800_v46 = vpop.f32.mrb[46].mxu0  ;;  %v3318_v48 = vpack.c.bf16 %v3696_v39, %v3688_v16 }
 0x299   : > { %v3700_v49 = vpop.eup %3699  ;;  %3719 = vtanh.f32 %v1884_v43  ;;  %v1801_v50 = vadd.f32 %v1800_v46, %v4625_v5  ;;  %v1802_v53 = vpop.f32.mrb[47].mxu0  ;;  %3309 = vmatprep.subr.bf16.mxu0 %v3308_v20  ;;  %v3316_v58 = vpack.c.bf16 %v3698_v44, %v3690_v41 }
 0x29a   : > { %v3702_v63 = vpop.eup %3701  ;;  %3721 = vtanh.f32 %v1886_v45  ;;  %v1889_v1 = vpop.f32.mrb[46].mxu1  ;;  %v1803_v3 = vadd.f32 %v1802_v53, %v4625_v5  ;;  %3311 = vmatpush1.bf16.msra.mxu0 %v3310_v42 }
 0x29b   : > { %v3704_v52 = vpop.eup %3703  ;;  %3723 = vtanh.f32 %v1801_v50  ;;  %v1890_v0 = vadd.f32 %v1889_v1, %v4625_v5  ;;  %v1891_v4 = vpop.f32.mrb[47].mxu1  ;;  %3317 = vmatprep.subr.bf16.mxu1 %v3316_v58 }
 0x29c   : > { %v3706_v22 = vpop.eup %3705  ;;  %3725 = vtanh.f32 %v1803_v3  ;;  %v1892_v51 = vadd.f32 %v1891_v4, %v4625_v5  ;;  %3319 = vmatpush1.bf16.msra.mxu1 %v3318_v48  ;;  %v1960_v35 = vpop.f32.mrb[48].mxu0 }
 0x29d   : > { %v3708_v61 = vpop.eup %3707  ;;  %3727 = vtanh.f32 %v1890_v0  ;;  %v1961_v6 = vadd.f32 %v1960_v35, %v4608_v62  ;;  %v1962_v60 = vpop.f32.mrb[49].mxu0  ;;  %3160 = vmatmul.mubr.msk.f32.vlgmr.msra.gmra.mrb[64].mxu0 %vm709_vm0, %v4649_v57 }
 0x29e   : > { %v3710_v8 = vpop.eup %3709  ;;  %3729 = vtanh.f32 %v1892_v51  ;;  %v2049_v23 = vpop.f32.mrb[48].mxu1  ;;  %v1963_v10 = vadd.f32 %v1962_v60, %v4608_v62  ;;  %v3322_v13 = vpack.c.bf16 %v3708_v61, %v3700_v49  ;;  %2534 = vmatprep.mubr.f32.mxu0 %v3860_v19 }
 0x29f   : > { %v3712_v11 = vpop.eup %3711  ;;  %3731 = vtanh.f32 %v1961_v6  ;;  %v2050_v55 = vadd.f32 %v2049_v23, %v4608_v62  ;;  %v2051_v14 = vpop.f32.mrb[49].mxu1  ;;  %3161 = vmatmul.mubr.msk.f32.vlgmr.msra.gmra.mrb[64].mxu1 %vm709_vm0, %v4649_v57  ;;  %v3320_v15 = vpack.c.bf16 %v3710_v8, %v3702_v63 }
 0x2a0   : > { %v3714_v17 = vpop.eup %3713  ;;  %3733 = vtanh.f32 %v1963_v10  ;;  %v2052_v47 = vadd.f32 %v2051_v14, %v4608_v62  ;;  %v1966_v18 = vpop.f32.mrb[50].mxu0  ;;  %v3330_v54 = vpack.c.bf16 %v3712_v11, %v3704_v52  ;;  %2605 = vmatprep.mubr.f32.mxu1 %v3860_v19 }
 0x2a1   : > { %v3716_v27 = vpop.eup %3715  ;;  %3735 = vtanh.f32 %v2050_v55  ;;  %v1967_v28 = vadd.f32 %v1966_v18, %v4613_v26  ;;  %v1968_v29 = vpop.f32.mrb[51].mxu0  ;;  %3321 = vmatprep.subr.bf16.mxu0 %v3320_v15  ;;  %v3328_v2 = vpack.c.bf16 %v3714_v17, %v3706_v22 }
 0x2a2   : > { %v3718_v30 = vpop.eup %3717  ;;  %3737 = vtanh.f32 %v2052_v47  ;;  %v2055_v9 = vpop.f32.mrb[50].mxu1  ;;  %v1969_v32 = vadd.f32 %v1968_v29, %v4613_v26  ;;  %3323 = vmatpush1.bf16.msra.mxu0 %v3322_v13 }
 0x2a3   : > { %v3720_v16 = vpop.eup %3719  ;;  %3739 = vtanh.f32 %v1967_v28  ;;  %v2056_v34 = vadd.f32 %v2055_v9, %v4613_v26  ;;  %v2057_v33 = vpop.f32.mrb[51].mxu1  ;;  %3329 = vmatprep.subr.bf16.mxu1 %v3328_v2 }
 0x2a4   : > { %v3722_v41 = vpop.eup %3721  ;;  %3741 = vtanh.f32 %v1969_v32  ;;  %v2058_v37 = vadd.f32 %v2057_v33, %v4613_v26  ;;  %3331 = vmatpush1.bf16.msra.mxu1 %v3330_v54  ;;  %v1972_v12 = vpop.f32.mrb[52].mxu0 }
 0x2a5   : > { %v3724_v56 = vpop.eup %3723  ;;  %3743 = vtanh.f32 %v2056_v34  ;;  %v1973_v7 = vadd.f32 %v1972_v12, %v4619_v40  ;;  %v1974_v36 = vpop.f32.mrb[53].mxu0 }
 0x2a6   : > { %v3726_v38 = vpop.eup %3725  ;;  %3745 = vtanh.f32 %v2058_v37  ;;  %v2061_v25 = vpop.f32.mrb[52].mxu1  ;;  %v1975_v31 = vadd.f32 %v1974_v36, %v4619_v40  ;;  %v3326_v42 = vpack.c.bf16 %v3724_v56, %v3716_v27 }
 0x2a7   : > { %v3728_v39 = vpop.eup %3727  ;;  %3747 = vtanh.f32 %v1973_v7  ;;  %v2062_v43 = vadd.f32 %v2061_v25, %v4619_v40  ;;  %v2063_v59 = vpop.f32.mrb[53].mxu1  ;;  %v3324_v20 = vpack.c.bf16 %v3726_v38, %v3718_v30 }
 0x2a8   : > { %v3730_v44 = vpop.eup %3729  ;;  %3749 = vtanh.f32 %v1975_v31  ;;  %v2064_v45 = vadd.f32 %v2063_v59, %v4619_v40  ;;  %v1978_v46 = vpop.f32.mrb[54].mxu0  ;;  %v3334_v48 = vpack.c.bf16 %v3728_v39, %v3720_v16 }
 0x2a9   : > { %v3732_v49 = vpop.eup %3731  ;;  %3751 = vtanh.f32 %v2062_v43  ;;  %v1979_v50 = vadd.f32 %v1978_v46, %v4625_v5  ;;  %v1980_v53 = vpop.f32.mrb[55].mxu0  ;;  %3325 = vmatprep.subr.bf16.mxu0 %v3324_v20  ;;  %v3332_v58 = vpack.c.bf16 %v3730_v44, %v3722_v41 }
 0x2aa   : > { %v3734_v63 = vpop.eup %3733  ;;  %3753 = vtanh.f32 %v2064_v45  ;;  %v2067_v1 = vpop.f32.mrb[54].mxu1  ;;  %v1981_v3 = vadd.f32 %v1980_v53, %v4625_v5  ;;  %3327 = vmatpush1.bf16.msra.mxu0 %v3326_v42 }
 0x2ab   : > { %v3736_v52 = vpop.eup %3735  ;;  %3755 = vtanh.f32 %v1979_v50  ;;  %v2068_v0 = vadd.f32 %v2067_v1, %v4625_v5  ;;  %v2069_v4 = vpop.f32.mrb[55].mxu1  ;;  %3333 = vmatprep.subr.bf16.mxu1 %v3332_v58 }
 0x2ac   : > { %v3738_v22 = vpop.eup %3737  ;;  %3757 = vtanh.f32 %v1981_v3  ;;  %v2070_v51 = vadd.f32 %v2069_v4, %v4625_v5  ;;  %3335 = vmatpush1.bf16.msra.mxu1 %v3334_v48  ;;  %v2138_v35 = vpop.f32.mrb[56].mxu0 }
 0x2ad   : > { %v3740_v61 = vpop.eup %3739  ;;  %3759 = vtanh.f32 %v2068_v0  ;;  %v2139_v6 = vadd.f32 %v2138_v35, %v4608_v62  ;;  %v2140_v60 = vpop.f32.mrb[57].mxu0  ;;  %3162 = vmatmul.mubr.msk.f32.vlgmr.msra.gmra.mrb[66].mxu0 %vm709_vm0, %v4649_v57 }
 0x2ae   : > { %v3742_v8 = vpop.eup %3741  ;;  %3761 = vtanh.f32 %v2070_v51  ;;  %v2227_v23 = vpop.f32.mrb[56].mxu1  ;;  %v2141_v10 = vadd.f32 %v2140_v60, %v4608_v62  ;;  %v3338_v13 = vpack.c.bf16 %v3740_v61, %v3732_v49  ;;  %2676 = vmatprep.mubr.f32.mxu0 %v3860_v19 }
 0x2af   : > { %v3744_v11 = vpop.eup %3743  ;;  %3763 = vtanh.f32 %v2139_v6  ;;  %v2228_v55 = vadd.f32 %v2227_v23, %v4608_v62  ;;  %v2229_v14 = vpop.f32.mrb[57].mxu1  ;;  %3163 = vmatmul.mubr.msk.f32.vlgmr.msra.gmra.mrb[66].mxu1 %vm709_vm0, %v4649_v57  ;;  %v3336_v15 = vpack.c.bf16 %v3742_v8, %v3734_v63 }
 0x2b0   : > { %v3746_v17 = vpop.eup %3745  ;;  %3765 = vtanh.f32 %v2141_v10  ;;  %v2230_v47 = vadd.f32 %v2229_v14, %v4608_v62  ;;  %v2144_v18 = vpop.f32.mrb[58].mxu0  ;;  %v3346_v54 = vpack.c.bf16 %v3744_v11, %v3736_v52  ;;  %2747 = vmatprep.mubr.f32.mxu1 %v3860_v19 }
 0x2b1   : > { %v3748_v27 = vpop.eup %3747  ;;  %3767 = vtanh.f32 %v2228_v55  ;;  %v2145_v28 = vadd.f32 %v2144_v18, %v4613_v26  ;;  %v2146_v29 = vpop.f32.mrb[59].mxu0  ;;  %3337 = vmatprep.subr.bf16.mxu0 %v3336_v15  ;;  %v3344_v2 = vpack.c.bf16 %v3746_v17, %v3738_v22 }
 0x2b2   : > { %v3750_v30 = vpop.eup %3749  ;;  %3769 = vtanh.f32 %v2230_v47  ;;  %v2233_v9 = vpop.f32.mrb[58].mxu1  ;;  %v2147_v32 = vadd.f32 %v2146_v29, %v4613_v26  ;;  %3339 = vmatpush1.bf16.msra.mxu0 %v3338_v13 }
 0x2b3   : > { %v3752_v16 = vpop.eup %3751  ;;  %3771 = vtanh.f32 %v2145_v28  ;;  %v2234_v62 = vadd.f32 %v2233_v9, %v4613_v26  ;;  %v2235_v34 = vpop.f32.mrb[59].mxu1  ;;  %3345 = vmatprep.subr.bf16.mxu1 %v3344_v2 }
 0x2b4   : > { %v3754_v33 = vpop.eup %3753  ;;  %3773 = vtanh.f32 %v2147_v32  ;;  %v2236_v41 = vadd.f32 %v2235_v34, %v4613_v26  ;;  %3347 = vmatpush1.bf16.msra.mxu1 %v3346_v54  ;;  %v2150_v37 = vpop.f32.mrb[60].mxu0 }
 0x2b5   : > { %v3756_v12 = vpop.eup %3755  ;;  %3775 = vtanh.f32 %v2234_v62  ;;  %v2151_v56 = vadd.f32 %v2150_v37, %v4619_v40  ;;  %v2152_v7 = vpop.f32.mrb[61].mxu0 }
 0x2b6   : > { %v3758_v36 = vpop.eup %3757  ;;  %3777 = vtanh.f32 %v2236_v41  ;;  %v2239_v38 = vpop.f32.mrb[60].mxu1  ;;  %v2153_v25 = vadd.f32 %v2152_v7, %v4619_v40  ;;  %v3342_v31 = vpack.c.bf16 %v3756_v12, %v3748_v27 }
 0x2b7   : > { %v3760_v42 = vpop.eup %3759  ;;  %3779 = vtanh.f32 %v2151_v56  ;;  %v2240_v39 = vadd.f32 %v2239_v38, %v4619_v40  ;;  %v2241_v43 = vpop.f32.mrb[61].mxu1  ;;  %v3340_v59 = vpack.c.bf16 %v3758_v36, %v3750_v30 }
 0x2b8   : > { %v3762_v26 = vpop.eup %3761  ;;  %3781 = vtanh.f32 %v2153_v25  ;;  %v2242_v20 = vadd.f32 %v2241_v43, %v4619_v40  ;;  %v2156_v44 = vpop.f32.mrb[62].mxu0  ;;  %v3350_v45 = vpack.c.bf16 %v3760_v42, %v3752_v16 }
 0x2b9   : > { %v3764_v46 = vpop.eup %3763  ;;  %3783 = vtanh.f32 %v2240_v39  ;;  %v2157_v48 = vadd.f32 %v2156_v44, %v4625_v5  ;;  %v2158_v49 = vpop.f32.mrb[63].mxu0  ;;  %3341 = vmatprep.subr.bf16.mxu0 %v3340_v59  ;;  %v3348_v50 = vpack.c.bf16 %v3762_v26, %v3754_v33 }
 0x2ba   : > { %v3766_v53 = vpop.eup %3765  ;;  %3785 = vtanh.f32 %v2242_v20  ;;  %v2245_v58 = vpop.f32.mrb[62].mxu1  ;;  %v2159_v63 = vadd.f32 %v2158_v49, %v4625_v5  ;;  %3343 = vmatpush1.bf16.msra.mxu0 %v3342_v31 }
 0x2bb   : > { %v3768_v1 = vpop.eup %3767  ;;  %3787 = vtanh.f32 %v2157_v48  ;;  %v2246_v3 = vadd.f32 %v2245_v58, %v4625_v5  ;;  %v2247_v40 = vpop.f32.mrb[63].mxu1  ;;  %3349 = vmatprep.subr.bf16.mxu1 %v3348_v50 }
 0x2bc   : > { %v3770_v52 = vpop.eup %3769  ;;  %3789 = vtanh.f32 %v2159_v63  ;;  %v2248_v0 = vadd.f32 %v2247_v40, %v4625_v5  ;;  %3351 = vmatpush1.bf16.msra.mxu1 %v3350_v45  ;;  %v2319_v28 = vpop.permute.xlu0 %2318 }
 0x2bd   : > { %v3772_v4 = vpop.eup %3771  ;;  %3791 = vtanh.f32 %v2246_v3  ;;  %3164 = vmatmul.mubr.msk.f32.vlgmr.msra.gmra.mrb[68].mxu0 %vm709_vm0, %v4649_v57  ;;  %v2324_v2 = vrot.slane %v2319_v28, %v4029_v24 }
 0x2be   : > { %v3774_v22 = vpop.eup %3773  ;;  %3793 = vtanh.f32 %v2248_v0  ;;  %v3354_v51 = vpack.c.bf16 %v3772_v4, %v3764_v46  ;;  %2818 = vmatprep.mubr.f32.mxu0 %v3860_v19 }
 0x2bf   : > { %v3776_v35 = vpop.eup %3775  ;;  %3165 = vmatmul.mubr.msk.f32.vlgmr.msra.gmra.mrb[68].mxu1 %vm709_vm0, %v4649_v57  ;;  %v3352_v61 = vpack.c.bf16 %v3774_v22, %v3766_v53 }
 0x2c0   : > { %v3778_v6 = vpop.eup %3777  ;;  %v3362_v60 = vpack.c.bf16 %v3776_v35, %v3768_v1  ;;  %2889 = vmatprep.mubr.f32.mxu1 %v3860_v19  ;;  %v3861_v19 = vmov 1966171168  }
 0x2c1   : > { %v3780_v5 = vpop.eup %3779  ;;  %3353 = vmatprep.subr.bf16.mxu0 %v3352_v61  ;;  %v3360_v8 = vpack.c.bf16 %v3778_v6, %v3770_v52  ;;  %v2917_v27 = vunpack.c.l.s4 %v3861_v19 }
 0x2c2   : > { %v3782_v23 = vpop.eup %3781  ;;  %3355 = vmatpush1.bf16.msra.mxu0 %v3354_v51 }
 0x2c3   : > { %v3784_v10 = vpop.eup %3783  ;;  %3361 = vmatprep.subr.bf16.mxu1 %v3360_v8  ;;  %v2918_v29 = vunpack.c.0.s8 %v2917_v27 }
 0x2c4   : > { %v3786_v13 = vpop.eup %3785  ;;  %3363 = vmatpush1.bf16.msra.mxu1 %v3362_v60 }
 0x2c5   : > { %v3788_v11 = vpop.eup %3787  ;;  %v2921_v34 = vsub.s32 %v2918_v29, %v4019_v21 }
 0x2c6   : > { %v3790_v55 = vpop.eup %3789  ;;  %v3358_v14 = vpack.c.bf16 %v3788_v11, %v3780_v5 }
 0x2c7   : > { %v3792_v15 = vpop.eup %3791  ;;  %v3356_v17 = vpack.c.bf16 %v3790_v55, %v3782_v23 }
 0x2c8   : > { %v3794_v47 = vpop.eup %3793  ;;  %v3366_v18 = vpack.c.bf16 %v3792_v15, %v3784_v10 }
 0x2c9   : > { %3357 = vmatprep.subr.bf16.mxu0 %v3356_v17  ;;  %v3364_v54 = vpack.c.bf16 %v3794_v47, %v3786_v13 }
 0x2ca   : > { %3359 = vmatpush1.bf16.msra.mxu0 %v3358_v14 }
 0x2cb   : > { %3365 = vmatprep.subr.bf16.mxu1 %v3364_v54 }
 0x2cc   : > { %3367 = vmatpush1.bf16.msra.mxu1 %v3366_v18 }
 0x2cd   : > { %3166 = vmatmul.mubr.msk.f32.vlgmr.msra.gmra.mrb[70].mxu0 %vm709_vm0, %v4649_v57 }
 0x2cf   : > { %3167 = vmatmul.mubr.msk.f32.vlgmr.msra.gmra.mrb[70].mxu1 %vm709_vm0, %v4649_v57 }
 0x370   : > { %v2394_v30 = vpop.f32.mrb[64].mxu0 }
 0x371   : > { %v2395_v9 = vadd.f32 %v2394_v30, %v2324_v2  ;;  %v2396_v32 = vpop.f32.mrb[65].mxu0 }
 0x372   : > { %v2465_v16 = vpop.f32.mrb[64].mxu1  ;;  %v2397_v62 = vadd.f32 %v2396_v32, %v2324_v2 }
 0x373   : > { %v2466_v33 = vadd.f32 %v2465_v16, %v2324_v2  ;;  %v2467_v41 = vpop.f32.mrb[65].mxu1 }
 0x374   : > { %v2912_v37 = vcombine.low %v2395_v9, %v2397_v62  ;;  %v2468_v12 = vadd.f32 %v2467_v41, %v2324_v2 }
 0x376   : > { %v2922_v56 = vrot.slane %v2912_v37, %v2921_v34  ;;  %v2913_v57 = vcombine.low %v2466_v33, %v2468_v12 }
 0x378   : > { %v2929_v7 = vrot.slane %v2913_v57, %v2921_v34 }
 0x37a   : > { %v2944_v36 = vcombine.low %v2922_v56, %v2929_v7 }
 0x37c   : > { %v2952_v46 = vrot.slane %v2944_v36, %v2921_v34 }
 0x380   : > { %v2536_v38 = vpop.f32.mrb[66].mxu0 }
 0x381   : > { %v2537_v25 = vadd.f32 %v2536_v38, %v2324_v2  ;;  %v2538_v31 = vpop.f32.mrb[67].mxu0 }
 0x382   : > { %v2607_v24 = vpop.f32.mrb[66].mxu1  ;;  %v2539_v42 = vadd.f32 %v2538_v31, %v2324_v2 }
 0x383   : > { %v2608_v39 = vadd.f32 %v2607_v24, %v2324_v2  ;;  %v2609_v43 = vpop.f32.mrb[67].mxu1 }
 0x384   : > { %v2914_v59 = vcombine.low %v2537_v25, %v2539_v42  ;;  %v2610_v26 = vadd.f32 %v2609_v43, %v2324_v2 }
 0x386   : > { %v2936_v20 = vrot.slane %v2914_v59, %v2921_v34  ;;  %v2915_v21 = vcombine.low %v2608_v39, %v2610_v26 }
 0x388   : > { %v2943_v44 = vrot.slane %v2915_v21, %v2921_v34 }
 0x38a   : > { %v2945_v45 = vcombine.low %v2936_v20, %v2943_v44 }
 0x38c   : > { %v2959_v48 = vrot.slane %v2945_v45, %v2921_v34 }
 0x38e   : > { %v2960_v49 = vcombine.low %v2952_v46, %v2959_v48 }
 0x390   : > { %3012 = vst [vmem:[%s4712_s29] sm:$0xff] %v2960_v49  ;;  %v2678_v50 = vpop.f32.mrb[68].mxu0 }
 0x391   : > { %v2679_v53 = vadd.f32 %v2678_v50, %v2324_v2  ;;  %v2680_v58 = vpop.f32.mrb[69].mxu0 }
 0x392   : > { %v2749_v63 = vpop.f32.mrb[68].mxu1  ;;  %v2681_v1 = vadd.f32 %v2680_v58, %v2324_v2 }
 0x393   : > { %v2750_v3 = vadd.f32 %v2749_v63, %v2324_v2  ;;  %v2751_v40 = vpop.f32.mrb[69].mxu1 }
 0x394   : > { %v2961_v52 = vcombine.low %v2679_v53, %v2681_v1  ;;  %v2752_v0 = vadd.f32 %v2751_v40, %v2324_v2 }
 0x396   : > { %v2971_v4 = vrot.slane %v2961_v52, %v2921_v34  ;;  %v2962_v22 = vcombine.low %v2750_v3, %v2752_v0 }
 0x398   : > { %v2978_v51 = vrot.slane %v2962_v22, %v2921_v34 }
 0x39a   : > { %v2993_v35 = vcombine.low %v2971_v4, %v2978_v51 }
 0x39c   : > { %v3001_v47 = vrot.slane %v2993_v35, %v2921_v34 }
 0x3a0   : > { %v2820_v61 = vpop.f32.mrb[70].mxu0 }
 0x3a1   : > { %v2821_v6 = vadd.f32 %v2820_v61, %v2324_v2  ;;  %v2822_v60 = vpop.f32.mrb[71].mxu0 }
 0x3a2   : > { %v2891_v5 = vpop.f32.mrb[70].mxu1  ;;  %v2823_v8 = vadd.f32 %v2822_v60, %v2324_v2 }
 0x3a3   : > { %v2892_v23 = vadd.f32 %v2891_v5, %v2324_v2  ;;  %v2893_v10 = vpop.f32.mrb[71].mxu1 }
 0x3a4   : > { %v2963_v13 = vcombine.low %v2821_v6, %v2823_v8  ;;  %v2894_v11 = vadd.f32 %v2893_v10, %v2324_v2 }
 0x3a6   : > { %v2985_v55 = vrot.slane %v2963_v13, %v2921_v34  ;;  %v2964_v14 = vcombine.low %v2892_v23, %v2894_v11 }
 0x3a8   : > { %v2992_v15 = vrot.slane %v2964_v14, %v2921_v34 }
 0x3aa   : > { %v2994_v17 = vcombine.low %v2985_v55, %v2992_v15  ;;  %3021 = sbr.rel (!%p3954_p5) target bundleno = 972 (0x3cc), region = 60 }
 0x3ac   : > { %v3008_v18 = vrot.slane %v2994_v17, %v2921_v34 }
 0x3ae   : > { %v3009_v54 = vcombine.low %v3001_v47, %v3008_v18 }
 0x3b0   : > { %3013 = vst [vmem:[%s4712_s29 + $0x8] sm:$0xff] %v3009_v54 }
 0x3b1   : > { %s4790_s10 = smov (!%p3024_p11, %s3023_s10), 16 }
 0x3b2   : > { %s4723_s15 = sshll.u32 %s4790_s10, 4 }
 0x3b3   : > { %s3028_s17 = ssub.s32 256, %s4723_s15 }
 0x3b4   : > { %3029 = vsyncadd %s4718_s30, %s3028_s17  ;;  %p3171_p12 = scmp.ne.s32.totalorder %s4723_s15, 0  ;;  %s3175_s18 = sshll.u32 %s3937_s8, 8 }
 0x3b5   : > { %s4732_s23 = scalar_lea.hbm %s4782_s9, %s3175_s18  ;;  %s3034_s28 = sshll.u32 %s4712_s29, 4  ;;  %s3035_s28 = int_to_ptr.vmem [resolvable:$true] %s3034_s28 }
 0x3b6   : > { %s3795_s24 = scalar_lea.vmem %s3035_s28, %s4723_s15  ;;  %s3862_s25 = smov [#allocation3]  }
 0x3b7   : > { %p3796_p13 = scmp.ne.s32.totalorder %s3035_s28, %s3795_s24  ;;  %s3799_s26 = sshll.u32 %s3862_s25, 4  ;;  %s3800_s26 = int_to_ptr.vmem [resolvable:$false] %s3799_s26 }
 0x3b8   : > { %s3801_s27 = scalar_lea.vmem %s3800_s26, 512  ;;  %p3802_p2 = scmp.lt.s32.totalorder %s3035_s28, %s3800_s26 }
 0x3b9   : > { %p3797_p0 = pnand %p3796_p13, %p3171_p12  ;;  %p3803_p3 = scmp.lt.s32.totalorder %s3801_s27, %s3795_s24 }
 0x3bb   : > { %p3798_p1 = pneg %p3797_p0  ;;  %p3804_p4 = por %p3803_p3, %p3802_p2 }
 0x3bd   : > { %p3805_p5 = pnand %p3804_p4, %p3798_p1 }
 0x3bf   : > { %3808 = shalt.err (!%p3805_p5)
}
 0x3c0   : > { %s3809_s8 = scalar_lea.hbm %s4732_s23, %s4723_s15  ;;  %s3813_s17 = scalar_lea.hbm %s4782_s9, 640 }
 0x3c1   : > { %p3810_p7 = scmp.ne.s32.totalorder %s4732_s23, %s3809_s8  ;;  %p3814_p10 = scmp.lt.u32.totalorder %s4732_s23, %s4782_s9 }
 0x3c2   : > { %p3815_p11 = scmp.lt.u32.totalorder %s3813_s17, %s3809_s8  ;;  %p3817_p0 = scmp.lt.u32.totalorder %s3809_s8, %s4732_s23 }
 0x3c3   : > { %p3811_p8 = pnand %p3810_p7, %p3171_p12 }
 0x3c4   : > { %p3816_p13 = por %p3815_p11, %p3814_p10 }
 0x3c5   : > { %p3812_p9 = pneg %p3811_p8 }
 0x3c6   : > { %p3818_p1 = por %p3817_p0, %p3816_p13 }
 0x3c8   : > { %p3819_p2 = pnand %p3818_p1, %p3812_p9 }
 0x3ca   : > { %3822 = shalt.err (!%p3819_p2)
}
 0x3cb   : > { %3037 = dma.vmem_to_hbm [thread:$0]  (%p3171_p12), %s3035_s28, %s4723_s15, %s4732_s23, %s4718_s30  }
 0x3cc PF: > { %p3373_p3 = scmp.ge.s32.totalorder %s3857_s14, 2  ;;  %s3046_s20 = sand.u32 1, %s3845_s11  }
 0x3cd   : > { %s3047_s24 = scalar_lea.sflag [#allocation4], %s3046_s20 }
 0x3ce   : > { %p3370_p4 = pnand %p3373_p3, %p3958_p6 }
 0x3d0   : > { %3840 = dma.done.wait (!%p3370_p4), %s3047_s24, 256  }
 0x3d1   : > { %3842 = vsyncadd (!%p3370_p4), %s3047_s24, 4294967040  ;;  %p21_p5 = scmp.ge.s32.totalorder %s3941_s16, 5   ;;  %s4785_s11 = smov %s3849_s12 }
 0x3d2   : > { %s4786_s12 = smov %s3853_s13  ;;  %s4787_s13 = smov %s3952_s19 }
 0x3d3   : > { %s4788_s14 = smov %s3941_s16  ;;  %23 = sbr.rel (!%p21_p5) target bundleno = 6 (0x6), region = 91 }
 0x3da   :  { %3052 = vsyncpa [#allocation4], 1 }
 0x3db   :  { %3054 = vsyncpa [#allocation4 + $0x1], 1 }

</bundles_post_ra>
